<compile_context>
chip_gen: v7x
topology: tpu7x:2x2x1
jax: 0.10.0
libtpu: 0.0.40
codegen_flags: <defaults>
</compile_context>

<pallas_src>
import math

import jax
import jax.numpy as jnp
from jax.experimental import pallas as pl
from jax.experimental.pallas import tpu as pltpu


# ----------------------------------------------------------------------------
# Model configuration (matches the nn.Module's __init__/build_* API)
# ----------------------------------------------------------------------------
EMBEDDING_SIZE = 32
ENTROPY_FEATURE_SIZE = 16
REF_FEATURE_SIZE = 16
INNER_UNITS = (32, 32)          # inner_layer_units for every build_*_net
# batch_norm=False for all nets -> LayerNorm branch is never built.

REF_INPUT_SIZE = EMBEDDING_SIZE
ENTROPY_INPUT_SIZE = EMBEDDING_SIZE + REF_FEATURE_SIZE

# Layer unit lists exactly as the PyTorch build_* methods construct them.
REF_PARAM_DIMS = [REF_INPUT_SIZE] + list(INNER_UNITS) + [REF_FEATURE_SIZE]
REF_FEAT_DIMS = [1] + list(INNER_UNITS) + [REF_FEATURE_SIZE]
PARAM_NET_DIMS = [ENTROPY_INPUT_SIZE] + list(INNER_UNITS) + [ENTROPY_FEATURE_SIZE + 1]
ENTROPY_FEAT_DIMS = [1] + list(INNER_UNITS) + [ENTROPY_FEATURE_SIZE]

LANE = 128                       # activation / slab lane width (one vreg wide)
TILE_B = 128                     # batch rows per grid step
F_IN = ((EMBEDDING_SIZE + 1 + 7) // 8) * 8   # fused layer-0 contraction = 40


# ----------------------------------------------------------------------------
# Static parameter-slab layout.
#   Weight matrices (rows are multiples of 8) first, then a packed block of
#   single-row tensors (biases + 1-wide entropy layer-0 weight), one row each.
# ----------------------------------------------------------------------------
def _build_layout():
    h0, h1 = INNER_UNITS
    rf, ef = REF_FEATURE_SIZE, ENTROPY_FEATURE_SIZE
    layout = {}
    cur = 0

    def add(name, rows, cols):
        nonlocal cur
        layout[name] = (cur, rows, cols)
        cur += rows

    # fused layer 0: [ ref_param(emb) | ref_feat(temp) | param_net(emb) ]
    add("F_W0", F_IN, 2 * h0 + h0)           # (40, 96)
    # fused (ref_parameter_net | ref_feature_net), block-diagonal
    add("R_W1", 2 * h0, 2 * h1)              # (64, 64)
    add("R_W2", 2 * h1, 2 * rf)              # (64, 32)
    # parameter_net
    add("P_W0r", rf, h0)                     # (16, 32)  p_ref rows of layer 0
    add("P_W1", h0, h1)                      # (32, 32)
    add("P_W2", h1, ef + 1)                  # (32, 17)
    # entropy_feature_net (layer 0 applied as a rank-1 broadcast, no matmul)
    add("E_W1", h0, h1)                      # (32, 32)
    add("E_W2", h1, ef)                      # (32, 16)
    # packed single-row block (1 row each, no 8-row padding)
    for name, cols in [("R_b0", 2 * h0), ("R_b1", 2 * h1), ("R_b2", 2 * rf),
                       ("P_b0", h0), ("P_b1", h1), ("P_b2", ef + 1),
                       ("E_W0", h0), ("E_b0", h0), ("E_b1", h1), ("E_b2", ef)]:
        add(name, 1, cols)
    total = ((cur + 7) // 8) * 8
    return layout, total


PARAM_LAYOUT, TOTAL_ROWS = _build_layout()   # 328 rows -> ~164 KiB f32 slab


# ----------------------------------------------------------------------------
# Kernel (one grid step processes TILE_B rows; slab is VMEM-resident)
# ----------------------------------------------------------------------------
def model0_kernel(act_ref, slab_ref, out_ref):
    f32 = jnp.float32
    rf, ef = REF_FEATURE_SIZE, ENTROPY_FEATURE_SIZE
    h0, h1 = INNER_UNITS

    def w(name):
        off, r, c = PARAM_LAYOUT[name]
        return slab_ref[off:off + r, 0:c]

    act = act_ref[...]                       # [TB, 128]  lane-dense
    lhs0 = act[:, 0:F_IN]                    # [TB, 40] = emb | temp | zeros
    ent = act[:, EMBEDDING_SIZE + 1:EMBEDDING_SIZE + 2]   # [TB, 1]

    # --- fused layer 0 (one MXU pass): ref_param(emb) | ref_feat(temp) | P(emb)
    f0 = jnp.dot(lhs0, w("F_W0"), preferred_element_type=f32)     # [TB, 96]
    r_h = jnp.maximum(f0[:, 0:2 * h0] + w("R_b0"), 0.0)           # R-nets hidden 0
    p_emb = f0[:, 2 * h0:2 * h0 + h0]                             # P-net emb partial

    # --- fused ref_parameter_net + ref_feature_net (block-diagonal) ----------
    r_h = jnp.maximum(jnp.dot(r_h, w("R_W1"), preferred_element_type=f32)
                      + w("R_b1"), 0.0)
    pr_xr = jnp.dot(r_h, w("R_W2"), preferred_element_type=f32) + w("R_b2")
    p_ref = pr_xr[:, 0:rf]                   # ref_parameter_net output
    x_ref = pr_xr[:, rf:2 * rf]              # ref_feature_net output

    # --- parameter_net (layer 0: emb partial precomputed, add p_ref part) ----
    ph = jnp.maximum(p_emb
                     + jnp.dot(p_ref, w("P_W0r"), preferred_element_type=f32)
                     + w("P_b0"), 0.0)
    ph = jnp.maximum(jnp.dot(ph, w("P_W1"), preferred_element_type=f32)
                     + w("P_b1"), 0.0)
    params = jnp.dot(ph, w("P_W2"), preferred_element_type=f32) + w("P_b2")
    p_entropy = params[:, 0:ef]              # [TB, ef]
    entropy0 = params[:, ef:ef + 1]          # [TB, 1]

    # --- entropy_feature_net (1-wide first layer -> rank-1 broadcast) --------
    e_ratio = ent * pl.reciprocal(entropy0, approx=True)   # entropy / entropy0
    eh = jnp.maximum(e_ratio * w("E_W0") + w("E_b0"), 0.0)
    eh = jnp.maximum(jnp.dot(eh, w("E_W1"), preferred_element_type=f32)
                     + w("E_b1"), 0.0)
    x_entropy = jnp.dot(eh, w("E_W2"), preferred_element_type=f32) + w("E_b2")

    # --- combine --------------------------------------------------------------
    # TODO(synk): output is (TB, 1) -> width-1 masked stores; lane-dense (1, TB)
    # layout would need an in-kernel transpose and only matters at huge batch.
    out_ref[...] = (jnp.sum(p_entropy * x_entropy, axis=1, keepdims=True)
                    + jnp.sum(p_ref * x_ref, axis=1, keepdims=True))


# ----------------------------------------------------------------------------
# Parameter init (deterministic, PyTorch-Linear-style uniform fan-in scaling)
# ----------------------------------------------------------------------------
def init_mlp_params(key, dims):
    ws, bs = [], []
    for din, dout in zip(dims[:-1], dims[1:]):
        key, kw, kb = jax.random.split(key, 3)
        bound = 1.0 / math.sqrt(din)
        ws.append(jax.random.uniform(kw, (din, dout), jnp.float32, -bound, bound))
        bs.append(jax.random.uniform(kb, (1, dout), jnp.float32, -bound, bound))
    return key, ws, bs


# ----------------------------------------------------------------------------
# Wrapper-side packing: all params -> one lane-dense VMEM slab
# ----------------------------------------------------------------------------
def pack_param_slab(nets):
    (rp_w, rp_b), (rf_w, rf_b), (pn_w, pn_b), (ef_w, ef_b) = nets
    h0, h1 = INNER_UNITS
    rf = REF_FEATURE_SIZE

    def z(r, c):
        return jnp.zeros((r, c), jnp.float32)

    # fused layer 0: rows 0:32 = embedding rows, row 32 = temperature row
    f_w0 = jnp.zeros((F_IN, 2 * h0 + h0), jnp.float32)
    f_w0 = f_w0.at[0:EMBEDDING_SIZE, 0:h0].set(rp_w[0])                  # ref_param
    f_w0 = f_w0.at[EMBEDDING_SIZE:EMBEDDING_SIZE + 1, h0:2 * h0].set(rf_w[0])  # ref_feat
    f_w0 = f_w0.at[0:EMBEDDING_SIZE, 2 * h0:3 * h0].set(pn_w[0][:EMBEDDING_SIZE])

    entries = {
        "F_W0": f_w0,
        "R_b0": jnp.concatenate([rp_b[0], rf_b[0]], axis=1),
        "R_W1": jnp.block([[rp_w[1], z(h0, h1)], [z(h0, h1), rf_w[1]]]),
        "R_b1": jnp.concatenate([rp_b[1], rf_b[1]], axis=1),
        "R_W2": jnp.block([[rp_w[2], z(h1, rf)], [z(h1, rf), rf_w[2]]]),
        "R_b2": jnp.concatenate([rp_b[2], rf_b[2]], axis=1),
        "P_W0r": pn_w[0][EMBEDDING_SIZE:, :],
        "P_b0": pn_b[0],
        "P_W1": pn_w[1], "P_b1": pn_b[1],
        "P_W2": pn_w[2], "P_b2": pn_b[2],
        "E_W0": ef_w[0], "E_b0": ef_b[0],
        "E_W1": ef_w[1], "E_b1": ef_b[1],
        "E_W2": ef_w[2], "E_b2": ef_b[2],
    }

    slab = jnp.zeros((TOTAL_ROWS, LANE), jnp.float32)
    for name, arr in entries.items():
        off, r, c = PARAM_LAYOUT[name]
        assert arr.shape == (r, c), (name, arr.shape, (r, c))
        slab = slab.at[off:off + r, :c].set(arr)
    return slab


# ----------------------------------------------------------------------------
# Forward wrapper: batch grid, slab resident across grid steps
# ----------------------------------------------------------------------------
def model0_ci_enorm_forward(x_in, slab, *, tile=TILE_B):
    n = x_in.shape[0]
    n_pad = ((n + tile - 1) // tile) * tile

    # One lane-dense activation slab: embedding @ lanes 0:32, temp @ 32, ent @ 33.
    act = jnp.zeros((n_pad, LANE), jnp.float32)
    act = act.at[:n, 0:EMBEDDING_SIZE].set(x_in[:, 2:2 + EMBEDDING_SIZE])
    act = act.at[:n, EMBEDDING_SIZE:EMBEDDING_SIZE + 1].set(x_in[:, 0:1])      # temperature
    act = act.at[:n, EMBEDDING_SIZE + 1:EMBEDDING_SIZE + 2].set(x_in[:, 1:2])  # entropy

    out = pl.pallas_call(
        model0_kernel,
        out_shape=jax.ShapeDtypeStruct((n_pad, 1), jnp.float32),
        grid_spec=pltpu.PrefetchScalarGridSpec(
            num_scalar_prefetch=0,
            grid=(n_pad // tile,),
            in_specs=[
                pl.BlockSpec((tile, LANE), lambda i: (i, 0)),          # activations
                pl.BlockSpec((TOTAL_ROWS, LANE), lambda i: (0, 0)),    # slab: resident
            ],
            out_specs=pl.BlockSpec((tile, 1), lambda i: (i, 0)),
        ),
        compiler_params=pltpu.CompilerParams(
            dimension_semantics=("parallel",)),
    )(act, slab)
    return out[:n]


# ----------------------------------------------------------------------------
# Pure-JAX reference (mirrors the original PyTorch module structure)
# ----------------------------------------------------------------------------
def _ref_mlp(x, ws, bs):
    for i, (w, b) in enumerate(zip(ws, bs)):
        x = x @ w + b
        if i < len(ws) - 1:
            x = jnp.maximum(x, 0.0)
    return x


def reference_forward(x_in, nets):
    (rp_w, rp_b), (rf_w, rf_b), (pn_w, pn_b), (ef_w, ef_b) = nets
    temperature = x_in[:, 0:1]
    entropy = x_in[:, 1:2]
    embedding = x_in[:, 2:]
    p_ref = _ref_mlp(embedding, rp_w, rp_b)
    x_ref = _ref_mlp(temperature, rf_w, rf_b)
    p_in = jnp.concatenate([embedding, p_ref], axis=1)
    params = _ref_mlp(p_in, pn_w, pn_b)
    p_entropy = params[:, :ENTROPY_FEATURE_SIZE]
    entropy0 = params[:, ENTROPY_FEATURE_SIZE:]
    x_entropy = _ref_mlp(entropy / entropy0, ef_w, ef_b)
    v_entropy = jnp.sum(p_entropy * x_entropy, axis=1)
    v_ref = jnp.sum(p_ref * x_ref, axis=1)
    return (v_entropy + v_ref)[:, None]


if __name__ == "__main__":
    key = jax.random.PRNGKey(0)

    key, rp_w, rp_b = init_mlp_params(key, REF_PARAM_DIMS)
    key, rf_w, rf_b = init_mlp_params(key, REF_FEAT_DIMS)
    key, pn_w, pn_b = init_mlp_params(key, PARAM_NET_DIMS)
    key, ef_w, ef_b = init_mlp_params(key, ENTROPY_FEAT_DIMS)
    nets = ((rp_w, rp_b), (rf_w, rf_b), (pn_w, pn_b), (ef_w, ef_b))

    slab = pack_param_slab(nets)

    key, kx = jax.random.split(key)
    N = 256   # 2 grid steps at TILE_B=128; per-step MXU LHS is a full tile
    # x_in = [temperature, entropy, embedding]  -> [N, 2 + embedding_size]
    x_in = jax.random.normal(kx, (N, 2 + EMBEDDING_SIZE), jnp.float32)
    # Keep entropy/temperature positive-ish so entropy/entropy0 is well behaved.
    x_in = x_in.at[:, 0:2].set(jnp.abs(x_in[:, 0:2]) + 0.5)

    out = model0_ci_enorm_forward(x_in, slab)
    out = jax.block_until_ready(out)

    ref = reference_forward(x_in, nets)
    assert out.shape == (N, 1)
    # Tolerance covers MXU default-precision f32 decomposition (contraction
    # order differs from the XLA reference) plus the approx EUP reciprocal.
    assert jnp.allclose(out, ref, rtol=5e-3, atol=5e-3), (out, ref)

    print("KERNEL_OK")
</pallas_src>

<mosaic_0001>
module attributes {stable_mosaic.version = 11 : i64} {
  func.func @model0_kernel(%arg0: i32, %arg1: memref<128x128xf32, #tpu.memory_space<vmem>>, %arg2: memref<328x128xf32, #tpu.memory_space<vmem>>, %arg3: memref<128x1xf32, #tpu.memory_space<vmem>>) attributes {dimension_semantics = [#tpu.dimension_semantics<parallel>], iteration_bounds = array<i64: 2>, scalar_prefetch = 0 : i64, scratch_operands = 0 : i64, tpu.core_type = #tpu.core_type<tc>, window_params = [{transform_indices = @transform_0, window_bounds = array<i64: 128, 128>}, {pipeline_mode = #tpu.pipeline_mode<synchronous>, transform_indices = @transform_1, window_bounds = array<i64: 328, 128>}, {transform_indices = @transform_2, window_bounds = array<i64: 128, 1>}]} {
    %c0 = arith.constant 0 : index
    %c0_0 = arith.constant 0 : index
    %0 = vector.load %arg1[%c0, %c0_0] : memref<128x128xf32, #tpu.memory_space<vmem>>, vector<128x128xf32>
    %1 = vector.extract_strided_slice %0 {offsets = [0, 0], sizes = [128, 40], strides = [1, 1]} : vector<128x128xf32> to vector<128x40xf32>
    %2 = vector.extract_strided_slice %0 {offsets = [0, 33], sizes = [128, 1], strides = [1, 1]} : vector<128x128xf32> to vector<128x1xf32>
    %c0_1 = arith.constant 0 : index
    %c0_2 = arith.constant 0 : index
    %3 = vector.load %arg2[%c0_1, %c0_2] : memref<328x128xf32, #tpu.memory_space<vmem>>, vector<40x96xf32>
    %cst = arith.constant dense<0.000000e+00> : vector<128x96xf32>
    %4 = tpu.matmul %1, %3, %cst {dimension_numbers = #tpu.dot_dimension_numbers<[1], [0], [0], [1], [0, 0, 1, 1], [], []>} : vector<128x40xf32>, vector<40x96xf32>, vector<128x96xf32> -> vector<128x96xf32>
    %5 = vector.extract_strided_slice %4 {offsets = [0, 0], sizes = [128, 64], strides = [1, 1]} : vector<128x96xf32> to vector<128x64xf32>
    %c312 = arith.constant 312 : index
    %c0_3 = arith.constant 0 : index
    %6 = vector.load %arg2[%c312, %c0_3] : memref<328x128xf32, #tpu.memory_space<vmem>>, vector<1x64xf32>
    %7 = vector.broadcast %6 : vector<1x64xf32> to vector<128x64xf32>
    %8 = arith.addf %5, %7 : vector<128x64xf32>
    %cst_4 = arith.constant 0.000000e+00 : f32
    %9 = vector.broadcast %cst_4 : f32 to vector<128x64xf32>
    %10 = arith.maximumf %8, %9 : vector<128x64xf32>
    %11 = vector.extract_strided_slice %4 {offsets = [0, 64], sizes = [128, 32], strides = [1, 1]} : vector<128x96xf32> to vector<128x32xf32>
    %c40 = arith.constant 40 : index
    %c0_5 = arith.constant 0 : index
    %12 = vector.load %arg2[%c40, %c0_5] : memref<328x128xf32, #tpu.memory_space<vmem>>, vector<64x64xf32>
    %cst_6 = arith.constant dense<0.000000e+00> : vector<128x64xf32>
    %13 = tpu.matmul %10, %12, %cst_6 {dimension_numbers = #tpu.dot_dimension_numbers<[1], [0], [0], [1], [0, 0, 1, 1], [], []>} : vector<128x64xf32>, vector<64x64xf32>, vector<128x64xf32> -> vector<128x64xf32>
    %c313 = arith.constant 313 : index
    %c0_7 = arith.constant 0 : index
    %14 = vector.load %arg2[%c313, %c0_7] : memref<328x128xf32, #tpu.memory_space<vmem>>, vector<1x64xf32>
    %15 = vector.broadcast %14 : vector<1x64xf32> to vector<128x64xf32>
    %16 = arith.addf %13, %15 : vector<128x64xf32>
    %cst_8 = arith.constant 0.000000e+00 : f32
    %17 = vector.broadcast %cst_8 : f32 to vector<128x64xf32>
    %18 = arith.maximumf %16, %17 : vector<128x64xf32>
    %c104 = arith.constant 104 : index
    %c0_9 = arith.constant 0 : index
    %19 = vector.load %arg2[%c104, %c0_9] : memref<328x128xf32, #tpu.memory_space<vmem>>, vector<64x32xf32>
    %cst_10 = arith.constant dense<0.000000e+00> : vector<128x32xf32>
    %20 = tpu.matmul %18, %19, %cst_10 {dimension_numbers = #tpu.dot_dimension_numbers<[1], [0], [0], [1], [0, 0, 1, 1], [], []>} : vector<128x64xf32>, vector<64x32xf32>, vector<128x32xf32> -> vector<128x32xf32>
    %c314 = arith.constant 314 : index
    %c0_11 = arith.constant 0 : index
    %21 = vector.load %arg2[%c314, %c0_11] : memref<328x128xf32, #tpu.memory_space<vmem>>, vector<1x32xf32>
    %22 = vector.broadcast %21 : vector<1x32xf32> to vector<128x32xf32>
    %23 = arith.addf %20, %22 : vector<128x32xf32>
    %24 = vector.extract_strided_slice %23 {offsets = [0, 0], sizes = [128, 16], strides = [1, 1]} : vector<128x32xf32> to vector<128x16xf32>
    %25 = vector.extract_strided_slice %23 {offsets = [0, 16], sizes = [128, 16], strides = [1, 1]} : vector<128x32xf32> to vector<128x16xf32>
    %c168 = arith.constant 168 : index
    %c0_12 = arith.constant 0 : index
    %26 = vector.load %arg2[%c168, %c0_12] : memref<328x128xf32, #tpu.memory_space<vmem>>, vector<16x32xf32>
    %cst_13 = arith.constant dense<0.000000e+00> : vector<128x32xf32>
    %27 = tpu.matmul %24, %26, %cst_13 {dimension_numbers = #tpu.dot_dimension_numbers<[1], [0], [0], [1], [0, 0, 1, 1], [], []>} : vector<128x16xf32>, vector<16x32xf32>, vector<128x32xf32> -> vector<128x32xf32>
    %28 = arith.addf %11, %27 : vector<128x32xf32>
    %c315 = arith.constant 315 : index
    %c0_14 = arith.constant 0 : index
    %29 = vector.load %arg2[%c315, %c0_14] : memref<328x128xf32, #tpu.memory_space<vmem>>, vector<1x32xf32>
    %30 = vector.broadcast %29 : vector<1x32xf32> to vector<128x32xf32>
    %31 = arith.addf %28, %30 : vector<128x32xf32>
    %cst_15 = arith.constant 0.000000e+00 : f32
    %32 = vector.broadcast %cst_15 : f32 to vector<128x32xf32>
    %33 = arith.maximumf %31, %32 : vector<128x32xf32>
    %c184 = arith.constant 184 : index
    %c0_16 = arith.constant 0 : index
    %34 = vector.load %arg2[%c184, %c0_16] : memref<328x128xf32, #tpu.memory_space<vmem>>, vector<32x32xf32>
    %cst_17 = arith.constant dense<0.000000e+00> : vector<128x32xf32>
    %35 = tpu.matmul %33, %34, %cst_17 {dimension_numbers = #tpu.dot_dimension_numbers<[1], [0], [0], [1], [0, 0, 1, 1], [], []>} : vector<128x32xf32>, vector<32x32xf32>, vector<128x32xf32> -> vector<128x32xf32>
    %c316 = arith.constant 316 : index
    %c0_18 = arith.constant 0 : index
    %36 = vector.load %arg2[%c316, %c0_18] : memref<328x128xf32, #tpu.memory_space<vmem>>, vector<1x32xf32>
    %37 = vector.broadcast %36 : vector<1x32xf32> to vector<128x32xf32>
    %38 = arith.addf %35, %37 : vector<128x32xf32>
    %cst_19 = arith.constant 0.000000e+00 : f32
    %39 = vector.broadcast %cst_19 : f32 to vector<128x32xf32>
    %40 = arith.maximumf %38, %39 : vector<128x32xf32>
    %c216 = arith.constant 216 : index
    %c0_20 = arith.constant 0 : index
    %41 = vector.load %arg2[%c216, %c0_20] : memref<328x128xf32, #tpu.memory_space<vmem>>, vector<32x17xf32>
    %cst_21 = arith.constant dense<0.000000e+00> : vector<128x17xf32>
    %42 = tpu.matmul %40, %41, %cst_21 {dimension_numbers = #tpu.dot_dimension_numbers<[1], [0], [0], [1], [0, 0, 1, 1], [], []>} : vector<128x32xf32>, vector<32x17xf32>, vector<128x17xf32> -> vector<128x17xf32>
    %c317 = arith.constant 317 : index
    %c0_22 = arith.constant 0 : index
    %43 = vector.load %arg2[%c317, %c0_22] : memref<328x128xf32, #tpu.memory_space<vmem>>, vector<1x17xf32>
    %44 = vector.broadcast %43 : vector<1x17xf32> to vector<128x17xf32>
    %45 = arith.addf %42, %44 : vector<128x17xf32>
    %46 = vector.extract_strided_slice %45 {offsets = [0, 0], sizes = [128, 16], strides = [1, 1]} : vector<128x17xf32> to vector<128x16xf32>
    %47 = vector.extract_strided_slice %45 {offsets = [0, 16], sizes = [128, 1], strides = [1, 1]} : vector<128x17xf32> to vector<128x1xf32>
    %48 = tpu.reciprocal %47 {approx = true} : vector<128x1xf32> -> vector<128x1xf32>
    %49 = arith.mulf %2, %48 : vector<128x1xf32>
    %c318 = arith.constant 318 : index
    %c0_23 = arith.constant 0 : index
    %50 = vector.load %arg2[%c318, %c0_23] : memref<328x128xf32, #tpu.memory_space<vmem>>, vector<1x32xf32>
    %51 = vector.broadcast %49 : vector<128x1xf32> to vector<128x32xf32>
    %52 = vector.broadcast %50 : vector<1x32xf32> to vector<128x32xf32>
    %53 = arith.mulf %51, %52 : vector<128x32xf32>
    %c319 = arith.constant 319 : index
    %c0_24 = arith.constant 0 : index
    %54 = vector.load %arg2[%c319, %c0_24] : memref<328x128xf32, #tpu.memory_space<vmem>>, vector<1x32xf32>
    %55 = vector.broadcast %54 : vector<1x32xf32> to vector<128x32xf32>
    %56 = arith.addf %53, %55 : vector<128x32xf32>
    %cst_25 = arith.constant 0.000000e+00 : f32
    %57 = vector.broadcast %cst_25 : f32 to vector<128x32xf32>
    %58 = arith.maximumf %56, %57 : vector<128x32xf32>
    %c248 = arith.constant 248 : index
    %c0_26 = arith.constant 0 : index
    %59 = vector.load %arg2[%c248, %c0_26] : memref<328x128xf32, #tpu.memory_space<vmem>>, vector<32x32xf32>
    %cst_27 = arith.constant dense<0.000000e+00> : vector<128x32xf32>
    %60 = tpu.matmul %58, %59, %cst_27 {dimension_numbers = #tpu.dot_dimension_numbers<[1], [0], [0], [1], [0, 0, 1, 1], [], []>} : vector<128x32xf32>, vector<32x32xf32>, vector<128x32xf32> -> vector<128x32xf32>
    %c320 = arith.constant 320 : index
    %c0_28 = arith.constant 0 : index
    %61 = vector.load %arg2[%c320, %c0_28] : memref<328x128xf32, #tpu.memory_space<vmem>>, vector<1x32xf32>
    %62 = vector.broadcast %61 : vector<1x32xf32> to vector<128x32xf32>
    %63 = arith.addf %60, %62 : vector<128x32xf32>
    %cst_29 = arith.constant 0.000000e+00 : f32
    %64 = vector.broadcast %cst_29 : f32 to vector<128x32xf32>
    %65 = arith.maximumf %63, %64 : vector<128x32xf32>
    %c280 = arith.constant 280 : index
    %c0_30 = arith.constant 0 : index
    %66 = vector.load %arg2[%c280, %c0_30] : memref<328x128xf32, #tpu.memory_space<vmem>>, vector<32x16xf32>
    %cst_31 = arith.constant dense<0.000000e+00> : vector<128x16xf32>
    %67 = tpu.matmul %65, %66, %cst_31 {dimension_numbers = #tpu.dot_dimension_numbers<[1], [0], [0], [1], [0, 0, 1, 1], [], []>} : vector<128x32xf32>, vector<32x16xf32>, vector<128x16xf32> -> vector<128x16xf32>
    %c321 = arith.constant 321 : index
    %c0_32 = arith.constant 0 : index
    %68 = vector.load %arg2[%c321, %c0_32] : memref<328x128xf32, #tpu.memory_space<vmem>>, vector<1x16xf32>
    %69 = vector.broadcast %68 : vector<1x16xf32> to vector<128x16xf32>
    %70 = arith.addf %67, %69 : vector<128x16xf32>
    %71 = arith.mulf %46, %70 : vector<128x16xf32>
    %cst_33 = arith.constant dense<0.000000e+00> : vector<128xf32>
    %72 = vector.multi_reduction <add>, %71, %cst_33 [1] : vector<128x16xf32> to vector<128xf32>
    %73 = vector.shape_cast %72 : vector<128xf32> to vector<128x1xf32>
    %74 = arith.mulf %24, %25 : vector<128x16xf32>
    %cst_34 = arith.constant dense<0.000000e+00> : vector<128xf32>
    %75 = vector.multi_reduction <add>, %74, %cst_34 [1] : vector<128x16xf32> to vector<128xf32>
    %76 = vector.shape_cast %75 : vector<128xf32> to vector<128x1xf32>
    %77 = arith.addf %73, %76 : vector<128x1xf32>
    %c0_35 = arith.constant 0 : index
    %c0_36 = arith.constant 0 : index
    %78 = vector.load %arg3[%c0_35, %c0_36] : memref<128x1xf32, #tpu.memory_space<vmem>>, vector<128x1xf32>
    tpu.vector_store %arg3[%c0_35, %c0_36], %77 {strides = array<i32>} : memref<128x1xf32, #tpu.memory_space<vmem>>, vector<128x1xf32>,
    return
  }
  func.func @transform_0(%arg0: i32) -> (i32, i32) {
    %c0_i32 = arith.constant 0 : i32
    %c0_i32_0 = arith.constant 0 : i32
    return %arg0, %c0_i32 : i32, i32
  }
  func.func @transform_1(%arg0: i32) -> (i32, i32) {
    %c0_i32 = arith.constant 0 : i32
    %c0_i32_0 = arith.constant 0 : i32
    %c0_i32_1 = arith.constant 0 : i32
    return %c0_i32, %c0_i32_0 : i32, i32
  }
  func.func @transform_2(%arg0: i32) -> (i32, i32) {
    %c0_i32 = arith.constant 0 : i32
    %c0_i32_0 = arith.constant 0 : i32
    return %arg0, %c0_i32 : i32, i32
  }
}

</mosaic_0001>

<bundles_post_ra>
// kernel: tpu_custom_call.1
= control target key start
LH: loop header
LB: loop body
LE: loop exit
PB: predicated region body
PF: predicated region fallthrough
CT: control target
= control target key end

     0   :  { %7 = vsyncpa [#allocation3], 0  ;;  %s4192_s0 = inlined_call_operand.hbm [shape: f32[256,128], index: 0, kind: input, shape index: {}]   ;;  %s4193_s1 = inlined_call_operand.hbm [shape: f32[328,128], index: 1, kind: input, shape index: {}]   ;;  %s4194_s2 = inlined_call_operand.vmem [shape: f32[256,1], index: 2, kind: output, shape index: {}]  }
   0x1   :  { %9 = vsyncpa [#allocation3 + $0x1], 0 }
   0x2   :  { %10 = vsyncpa [#allocation5], 0  ;;  %s3466_s9 = smov 0   ;;  %s3468_s10 = smov 0  }
   0x3   :  { %s3470_s11 = smov 0   ;;  %s3472_s12 = smov 0  }
   0x4 LB: > { %s2572_s13 = sadd.s32 4294967295, %s3441_s12   ;;  %p36_p0 = scmp.ne.s32.totalorder %s3433_s10, %s3429_s9  ;;  %s3441_s12 = sphi %s3472_s12, %s4210_s12   ;;  %s3437_s11 = sphi %s3470_s11, %s4209_s11   ;;  %s3433_s10 = sphi %s3468_s10, %s4208_s10   ;;  %s3429_s9 = sphi %s3466_s9, %s4207_s9  }
   0x5   : > { %p3488_p1 = scmp.eq.s32.totalorder %s2572_s13, 0  ;;  %p2574_p2 = scmp.ge.s32.totalorder %s3441_s12, 1 }
   0x6   : > { %p94_p3 = scmp.lt.s32.totalorder %s3441_s12, 3  ;;  %s3443_s17 = smov [#allocation4]  }
   0x7   : > { %s4199_s14 = scalar_select %p3488_p1, 1, 0 }
   0x8   : > { %p3496_p4 = por %p3488_p1, %p36_p0  ;;  %p3500_p5 = pnand %p2574_p2, %p94_p3 }
   0x9   : > { %s106_s18 = sshll.u32 %s3443_s17, 4  ;;  %s3513_s20 = sadd.s32 1, %s3441_s12   ;;  %s107_s18 = int_to_ptr.vmem [resolvable:$true] %s106_s18 }
   0xa   : > { %s4200_s15 = scalar_select %p3496_p4, 1, 0 }
   0xb   : > { %s4201_s16 = scalar_select %p3500_p5, 1, 0 }
   0xc   : > { %p3245_p6 = pneg %p3500_p5  ;;  %s23_s21 = sadd.s32 1, %s3437_s11 }
   0xd   : > { %s20_s22 = ssub.s32 %s3441_s12, %s3513_s20  ;;  %s3345_s25 = scalar_lea.hbm %s4193_s1, 5248 }
   0xe   : > { %p3508_p7 = pnand %p3245_p6, %p3488_p1  ;;  %p3346_p8 = scmp.ne.s32.totalorder %s4193_s1, %s3345_s25 }
   0xf   : > { %p3352_p12 = scmp.lt.u32.totalorder %s3345_s25, %s4193_s1 }
  0x10   : > { %p3347_p9 = pneg %p3508_p7 }
  0x12   : > { %p3348_p10 = pnand %p3347_p9, %p3346_p8 }
  0x14   : > { %p3349_p11 = pneg %p3348_p10 }
  0x16   : > { %p3354_p13 = pnand %p3352_p12, %p3349_p11 }
  0x18   : > { %3357 = shalt.err (!%p3354_p13)
}
  0x19   : > { %s3358_s30 = scalar_lea.vmem %s107_s18, 5248  ;;  %p3366_p6 = scmp.lt.s32.totalorder %s107_s18, %s107_s18 }
  0x1a   : > { %p3359_p0 = scmp.ne.s32.totalorder %s107_s18, %s3358_s30  ;;  %p3367_p1 = scmp.lt.s32.totalorder %s3358_s30, %s3358_s30 }
  0x1c   : > { %p3361_p2 = pnand %p3359_p0, %p3347_p9  ;;  %p3368_p4 = por %p3367_p1, %p3366_p6 }
  0x1e   : > { %p3362_p3 = pneg %p3361_p2 }
  0x20   : > { %p3369_p5 = pnand %p3368_p4, %p3362_p3 }
  0x22   : > { %3372 = shalt.err (!%p3369_p5)
}
  0x23   : > { %s3444_s3 = smov 128   ;;  %s3445_s4 = smov 8  }
  0x24   : > { %3248 = dma.hbm_to_vmem [thread:$0]  (!%p3508_p7), %s4193_s1, 5248, %s107_s18, [#allocation5], %s3444_s3, %s3444_s3, %s3445_s4  }
  0x25   : > { %p21_p1 = scmp.eq.s32.totalorder %s20_s22, 0  ;;  %p30_p4 = scmp.ne.s32.totalorder %s3437_s11, %s3433_s10 }
  0x26   : > { %p31_p5 = scmp.eq.s32.totalorder %s3441_s12, 0  ;;  %p3254_p8 = scmp.lt.s32.totalorder %s3441_s12, 2 }
  0x27   : > { %s3542_s7 = scalar_select %p21_p1, %s3437_s11, %s23_s21  }
  0x28   : > { %p32_p9 = por %p31_p5, %p30_p4  ;;  %s120_s8 = sand.u32 1, %s3437_s11  }
  0x29   : > { %s2577_s9 = sshll.u32 %s120_s8, 7  ;;  %s2725_s17 = sshll.u32 %s3441_s12, 11 }
  0x2a   : > { %s3549_s19 = scalar_lea.hbm %s4192_s0, %s2725_s17  ;;  %s124_s18 = scalar_lea.vmem [#allocation2], %s2577_s9 }
  0x2b   : > { %s131_s22 = sshll.u32 %s124_s18, 4  ;;  %p3553_p7 = pnand %p3254_p8, %p32_p9  ;;  %s3551_s22 = int_to_ptr.vmem [resolvable:$true] %s131_s22 }
  0x2c   : > { %s3557_s25 = scalar_lea.sflag [#allocation3], %s120_s8  ;;  %s3373_s26 = scalar_lea.hbm %s3549_s19, 2048 }
  0x2d   : > { %p3374_p10 = scmp.ne.s32.totalorder %s3549_s19, %s3373_s26  ;;  %p3375_p11 = pneg %p3553_p7 }
  0x2e   : > { %s3378_s29 = scalar_lea.hbm %s4192_s0, 4096  ;;  %p3379_p0 = scmp.lt.u32.totalorder %s3549_s19, %s4192_s0 }
  0x2f   : > { %p3376_p12 = pnand %p3375_p11, %p3374_p10  ;;  %p3380_p2 = scmp.lt.u32.totalorder %s3378_s29, %s3373_s26 }
  0x30   : > { %p3382_p6 = scmp.lt.u32.totalorder %s3373_s26, %s3549_s19 }
  0x31   : > { %p3377_p13 = pneg %p3376_p12  ;;  %p3381_p3 = por %p3380_p2, %p3379_p0 }
  0x33   : > { %p3383_p1 = por %p3382_p6, %p3381_p3 }
  0x35   : > { %p3384_p4 = pnand %p3383_p1, %p3377_p13 }
  0x37   : > { %3387 = shalt.err (!%p3384_p4)
}
  0x38   : > { %s3388_s6 = scalar_lea.vmem %s3551_s22, 2048  ;;  %s3446_s8 = smov [#allocation2]  }
  0x39   : > { %p3389_p5 = scmp.ne.s32.totalorder %s3551_s22, %s3388_s6  ;;  %s3393_s9 = sshll.u32 %s3446_s8, 4  ;;  %s3394_s9 = int_to_ptr.vmem [resolvable:$false] %s3393_s9 }
  0x3a   : > { %s3395_s17 = scalar_lea.vmem %s3394_s9, 4096  ;;  %p3396_p10 = scmp.lt.s32.totalorder %s3551_s22, %s3394_s9 }
  0x3b   : > { %p3391_p8 = pnand %p3389_p5, %p3375_p11  ;;  %p3397_p12 = scmp.lt.s32.totalorder %s3395_s17, %s3388_s6 }
  0x3d   : > { %p3392_p9 = pneg %p3391_p8  ;;  %p3398_p0 = por %p3397_p12, %p3396_p10 }
  0x3f   : > { %p3399_p2 = pnand %p3398_p0, %p3392_p9 }
  0x41   : > { %3402 = shalt.err (!%p3399_p2)
}
  0x42   : > { %3252 = dma.hbm_to_vmem [thread:$0]  (!%p3553_p7), %s3549_s19, 2048, %s3551_s22, %s3557_s25, %s3444_s3, %s3444_s3, %s3445_s4  }
  0x43   : > { %p4204_p11 = scmp.ne.s32.totalorder %s4201_s16, 0 }
  0x44   : > { %s145_s23 = sand.u32 (!%p4204_p11), 1, %s3433_s10   ;;  %p4205_p13 = scmp.ne.s32.totalorder (!%p4204_p11), %s4200_s15, 0 }
  0x45   : > { %143 = sbr.rel (%p4204_p11) target bundleno = 2513 (0x9d1), region = 28  ;;  %s2581_s24 = sshll.u32 (!%p4204_p11), %s145_s23, 7 }
  0x46   : > { %s146_s18 = scalar_lea.sflag (!%p4204_p11), [#allocation3], %s145_s23  ;;  %s3591_s26 = scalar_lea.vmem (!%p4204_p11), [#allocation2], %s2581_s24 }
  0x4c   : > { %3420 = dma.done.wait (%p4205_p13), %s146_s18, 2048  }
  0x4d   : > { %3422 = vsyncadd (%p4205_p13), %s146_s18, 4294965248  ;;  %p4206_p3 = scmp.ne.s32.totalorder %s4199_s14, 0 }
  0x4f   : > { %3424 = dma.done.wait (%p4206_p3), [#allocation5], 5248  }
  0x50   : > { %3426 = vsyncadd (%p4206_p3), [#allocation5], 4294962048  ;;  %vm202_vm0 = vcmask 326656   ;;  %v197_v0 = vld [vmem:[#allocation4] sm:$0xff]  ;;  %v198_v1 = vld [vmem:[#allocation4 + $0x8] sm:$0xff]  ;;  %vm446_vm1 = vcmask 523264  }
  0x51   : > { %v199_v2 = vld [vmem:[#allocation4 + $0x10] sm:$0xff]  ;;  %v3163_v3 = vpack.c.bf16 %v198_v1, %v197_v0  ;;  %v200_v4 = vld [vmem:[#allocation4 + $0x18] sm:$0xff]  ;;  %v181_v5 = vld [vmem:[%s3591_s26] sm:$0xff]  ;;  %vm864_vm2 = vcmask 130048   ;;  %s3447_s14 = smov 64   ;;  %vm1236_vm3 = vcmask 261120  }
  0x52   : > { %v3167_v6 = vpack.c.bf16 %v200_v4, %v199_v2  ;;  %2903 = vmatprep.mubr.msk.f32.mxu0 %vm202_vm0, %v181_v5  ;;  %v201_v7 = vld [vmem:[#allocation4 + $0x20] sm:$0xff]  ;;  %v433_v8 = vld [vmem:[#allocation4 + $0x28] sm:$0xff]  ;;  %v434_v9 = vld [vmem:[#allocation4 + $0x30] sm:$0xff]  ;;  %s3449_s15 = smov 17   ;;  %s3450_s16 = smov 112   ;;  %vm2478_vm4 = vcmask 7168  }
  0x53   : > { %3164 = vmatprep.subr.bf16.mxu0 %v3163_v3  ;;  %v435_v10 = vld [vmem:[#allocation4 + $0x38] sm:$0xff]  ;;  %v3171_v11 = vpack.c.bf16 %v434_v9, %v433_v8  ;;  %v436_v12 = vld [vmem:[#allocation4 + $0x40] sm:$0xff]  ;;  %v437_v14 = vld [vmem:[#allocation4 + $0x48] sm:$0xff]  ;;  %s2583_s3 = sshll.u32 %s2572_s13, 4 }
  0x54   : > { %3166 = vmatpush3.bf16.msra.mxu0 %v3163_v3  ;;  %v3175_v13 = vpack.c.bf16 %v436_v12, %v435_v10  ;;  %v438_v15 = vld [vmem:[#allocation4 + $0x50] sm:$0xff]  ;;  %v182_v16 = vld [vmem:[%s3591_s26 + $0x8] sm:$0xff]  ;;  %v184_v19 = vld [vmem:[%s3591_s26 + $0x18] sm:$0xff]  ;;  %p176_p7 = scmp.lt.s32.totalorder %s2583_s3, 31 }
  0x55   : > { %3168 = vmatprep.subr.bf16.mxu0 %v3167_v6  ;;  %3172 = vmatprep.subr.bf16.mxu1 %v3171_v11  ;;  %v183_v17 = vld [vmem:[%s3591_s26 + $0x10] sm:$0xff]  ;;  %v3179_v18 = vpack.c.bf16 %v438_v15, %v437_v14  ;;  %v185_v20 = vld [vmem:[%s3591_s26 + $0x20] sm:$0xff]  ;;  %v186_v21 = vld [vmem:[%s3591_s26 + $0x28] sm:$0xff] }
  0x56   : > { %3174 = vmatpush3.bf16.msra.mxu1 %v3171_v11  ;;  %v187_v22 = vld [vmem:[%s3591_s26 + $0x30] sm:$0xff]  ;;  %v188_v23 = vld [vmem:[%s3591_s26 + $0x38] sm:$0xff]  ;;  %v189_v24 = vld [vmem:[%s3591_s26 + $0x40] sm:$0xff]  ;;  %s4212_s3 = smov (!%p176_p7, %s2583_s3), 31 }
  0x57   : > { %3176 = vmatprep.subr.bf16.mxu1 %v3175_v13  ;;  %v190_v25 = vld [vmem:[%s3591_s26 + $0x48] sm:$0xff]  ;;  %v191_v26 = vld [vmem:[%s3591_s26 + $0x50] sm:$0xff]  ;;  %v192_v27 = vld [vmem:[%s3591_s26 + $0x58] sm:$0xff]  ;;  %s2584_s4 = sshll.u32 %s4212_s3, 3 }
  0x58   : > { %3170 = vmatpush3.bf16.msra.mxu0 %v3167_v6  ;;  %v193_v28 = vld [vmem:[%s3591_s26 + $0x60] sm:$0xff]  ;;  %v194_v29 = vld [vmem:[%s3591_s26 + $0x68] sm:$0xff]  ;;  %v195_v30 = vld [vmem:[%s3591_s26 + $0x70] sm:$0xff]  ;;  %s4145_s21 = scalar_lea.vmem %s4194_s2, %s2584_s4 }
  0x59   : > { %2901 = vmatprep.subr.mxu0 %v201_v7  ;;  %v196_v31 = vld [vmem:[%s3591_s26 + $0x78] sm:$0xff]  ;;  %v440_v33 = vld [vmem:[#allocation4 + $0x60] sm:$0xff]  ;;  %v656_v35 = vld [vmem:[#allocation4 + $0x68] sm:$0xff] }
  0x5a   : > { %3178 = vmatpush3.bf16.msra.mxu1 %v3175_v13  ;;  %v439_v32 = vld [vmem:[#allocation4 + $0x58] sm:$0xff]  ;;  %v657_v36 = vld [vmem:[#allocation4 + $0x70] sm:$0xff]  ;;  %v659_v39 = vld [vmem:[#allocation4 + $0x80] sm:$0xff] }
  0x5b   : > { %3180 = vmatprep.subr.bf16.mxu1 %v3179_v18  ;;  %v3183_v34 = vpack.c.bf16 %v440_v33, %v439_v32  ;;  %v658_v37 = vld [vmem:[#allocation4 + $0x78] sm:$0xff]  ;;  %v3187_v38 = vpack.c.bf16 %v657_v36, %v656_v35  ;;  %v660_v41 = vld [vmem:[#allocation4 + $0x88] sm:$0xff]  ;;  %v661_v42 = vld [vmem:[#allocation4 + $0x90] sm:$0xff] }
  0x5c   : > { %2902 = vmatpush3.msra.mxu0 %v201_v7  ;;  %v3191_v40 = vpack.c.bf16 %v659_v39, %v658_v37  ;;  %v3195_v43 = vpack.c.bf16 %v661_v42, %v660_v41  ;;  %v662_v44 = vld [vmem:[#allocation4 + $0x98] sm:$0xff]  ;;  %v663_v45 = vld [vmem:[#allocation4 + $0xa0] sm:$0xff]  ;;  %v862_v32 = vld [vmem:[#allocation4 + $0xa8] sm:$0xff] }
  0x5d   : > { %2904 = vmatmul.mubr.msk.f32.vlgmr.msra.gmra.mrb[0].mxu0 %vm202_vm0, %v182_v16  ;;  %3188 = vmatprep.subr.bf16.mxu0 %v3187_v38  ;;  %v3199_v46 = vpack.c.bf16 %v663_v45, %v662_v44  ;;  %v2601_v47 = vld [vmem:[#allocation4 + $0x138] ss:$0 sm:$0xff]  ;;  %v863_v33 = vld [vmem:[#allocation4 + $0xb0] sm:$0xff]  ;;  %v2602_v35 = vld [vmem:[#allocation4 + $0x139] ss:$0 sm:$0xff] }
  0x5e   : > { %2906 = vmatprep.mubr.msk.f32.mxu0 %vm202_vm0, %v183_v17  ;;  %3182 = vmatpush3.bf16.msra.mxu1 %v3179_v18 }
  0x5f   : > { %3184 = vmatprep.subr.bf16.mxu1 %v3183_v34  ;;  %3190 = vmatpush3.bf16.msra.mxu0 %v3187_v38 }
  0x60   : > { %3192 = vmatprep.subr.bf16.mxu0 %v3191_v40 }
  0x61   : > { %2907 = vmatmul.mubr.msk.f32.gmra.mrb[2].mxu0 %vm202_vm0, %v184_v19 }
  0x62   : > { %2909 = vmatprep.mubr.msk.f32.mxu0 %vm202_vm0, %v185_v20  ;;  %3186 = vmatpush3.bf16.msra.mxu1 %v3183_v34  ;;  %v3203_v34 = vpack.c.bf16 %v863_v33, %v862_v32 }
  0x63   : > { %3194 = vmatpush3.bf16.msra.mxu0 %v3191_v40 }
  0x64   : > { %3196 = vmatprep.subr.bf16.mxu0 %v3195_v43  ;;  %3204 = vmatprep.subr.bf16.mxu1 %v3203_v34 }
  0x65   : > { %2910 = vmatmul.mubr.msk.f32.gmra.mrb[4].mxu0 %vm202_vm0, %v186_v21 }
  0x66   : > { %2912 = vmatprep.mubr.msk.f32.mxu0 %vm202_vm0, %v187_v22 }
  0x67   : > { %3198 = vmatpush3.bf16.msra.mxu0 %v3195_v43 }
  0x68   : > { %3200 = vmatprep.subr.bf16.mxu0 %v3199_v46 }
  0x69   : > { %2913 = vmatmul.mubr.msk.f32.gmra.mrb[6].mxu0 %vm202_vm0, %v188_v23 }
  0x6a   : > { %2915 = vmatprep.mubr.msk.f32.mxu0 %vm202_vm0, %v189_v24 }
  0x6b   : > { %3202 = vmatpush3.bf16.msra.mxu0 %v3199_v46 }
  0x6d   : > { %2916 = vmatmul.mubr.msk.f32.gmra.mrb[8].mxu0 %vm202_vm0, %v190_v25 }
  0x6e   : > { %2918 = vmatprep.mubr.msk.f32.mxu0 %vm202_vm0, %v191_v26 }
  0x71   : > { %2919 = vmatmul.mubr.msk.f32.gmra.mrb[10].mxu0 %vm202_vm0, %v192_v27 }
  0x72   : > { %2921 = vmatprep.mubr.msk.f32.mxu0 %vm202_vm0, %v193_v28 }
  0x75   : > { %2922 = vmatmul.mubr.msk.f32.gmra.mrb[12].mxu0 %vm202_vm0, %v194_v29 }
  0x76   : > { %2924 = vmatprep.mubr.msk.f32.mxu0 %vm202_vm0, %v195_v30 }
  0x79   : > { %2925 = vmatmul.mubr.msk.f32.gmra.mrb[14].mxu0 %vm202_vm0, %v196_v31 }
 0x130   : > { %v3633_v48 = vpop.f32.mrb[0].mxu0 }
 0x131   : > { %v402_v49 = vadd.f32 %v3633_v48, %v2601_v47  ;;  %v3636_v50 = vpop.f32.mrb[1].mxu0 }
 0x132   : > { %v401_v51 = vadd.f32 %v2601_v47, %v3636_v50 }
 0x133   : > { %v418_v54 = vmax.f32 %v402_v49, 0.0 }
 0x134   : > { %v3639_v52 = vpop.f32.mrb[2].mxu0  ;;  %v417_v53 = vmax.f32 %v401_v51, 0.0 }
 0x135   : > { %v404_v55 = vadd.f32 %v3639_v52, %v2601_v47  ;;  %v3642_v56 = vpop.f32.mrb[3].mxu0 }
 0x136   : > { %v403_v57 = vadd.f32 %v2601_v47, %v3642_v56  ;;  %2943 = vmatprep.mubr.msk.f32.mxu1 %vm446_vm1, %v417_v53 }
 0x137   : > { %v420_v58 = vmax.f32 %v404_v55, 0.0  ;;  %2944 = vmatmul.mubr.msk.f32.vlgmr.msra.gmra.mrb[0].mxu1 %vm446_vm1, %v418_v54 }
 0x138   : > { %v419_v59 = vmax.f32 %v403_v57, 0.0  ;;  %v3647_v60 = vpop.f32.mrb[4].mxu0  ;;  %3206 = vmatpush3.bf16.msra.mxu1 %v3203_v34 }
 0x139   : > { %v406_v61 = vadd.f32 %v3647_v60, %v2601_v47  ;;  %v3650_v62 = vpop.f32.mrb[5].mxu0 }
 0x13a   : > { %v405_v63 = vadd.f32 %v2601_v47, %v3650_v62  ;;  %2946 = vmatprep.mubr.msk.f32.mxu1 %vm446_vm1, %v419_v59 }
 0x13b   : > { %v422_v0 = vmax.f32 %v406_v61, 0.0  ;;  %2947 = vmatmul.mubr.msk.f32.gmra.mrb[2].mxu1 %vm446_vm1, %v420_v58 }
 0x13c   : > { %v421_v1 = vmax.f32 %v405_v63, 0.0  ;;  %v3655_v2 = vpop.f32.mrb[6].mxu0 }
 0x13d   : > { %v408_v3 = vadd.f32 %v3655_v2, %v2601_v47  ;;  %v3658_v4 = vpop.f32.mrb[7].mxu0 }
 0x13e   : > { %v407_v5 = vadd.f32 %v2601_v47, %v3658_v4  ;;  %2949 = vmatprep.mubr.msk.f32.mxu1 %vm446_vm1, %v421_v1 }
 0x13f   : > { %v424_v6 = vmax.f32 %v408_v3, 0.0  ;;  %2950 = vmatmul.mubr.msk.f32.gmra.mrb[4].mxu1 %vm446_vm1, %v422_v0 }
 0x140   : > { %v423_v7 = vmax.f32 %v407_v5, 0.0  ;;  %v3663_v8 = vpop.f32.mrb[8].mxu0 }
 0x141   : > { %v410_v9 = vadd.f32 %v3663_v8, %v2601_v47  ;;  %v3666_v10 = vpop.f32.mrb[9].mxu0 }
 0x142   : > { %v409_v11 = vadd.f32 %v2601_v47, %v3666_v10  ;;  %2952 = vmatprep.mubr.msk.f32.mxu1 %vm446_vm1, %v423_v7 }
 0x143   : > { %v426_v12 = vmax.f32 %v410_v9, 0.0  ;;  %2953 = vmatmul.mubr.msk.f32.gmra.mrb[6].mxu1 %vm446_vm1, %v424_v6 }
 0x144   : > { %v425_v13 = vmax.f32 %v409_v11, 0.0  ;;  %v3671_v14 = vpop.f32.mrb[10].mxu0 }
 0x145   : > { %v412_v15 = vadd.f32 %v3671_v14, %v2601_v47  ;;  %v3674_v16 = vpop.f32.mrb[11].mxu0 }
 0x146   : > { %v411_v17 = vadd.f32 %v2601_v47, %v3674_v16  ;;  %2955 = vmatprep.mubr.msk.f32.mxu1 %vm446_vm1, %v425_v13 }
 0x147   : > { %v428_v18 = vmax.f32 %v412_v15, 0.0  ;;  %2956 = vmatmul.mubr.msk.f32.gmra.mrb[8].mxu1 %vm446_vm1, %v426_v12 }
 0x148   : > { %v427_v19 = vmax.f32 %v411_v17, 0.0  ;;  %v3679_v20 = vpop.f32.mrb[12].mxu0 }
 0x149   : > { %v414_v21 = vadd.f32 %v3679_v20, %v2601_v47  ;;  %v3682_v22 = vpop.f32.mrb[13].mxu0 }
 0x14a   : > { %v413_v23 = vadd.f32 %v2601_v47, %v3682_v22  ;;  %2958 = vmatprep.mubr.msk.f32.mxu1 %vm446_vm1, %v427_v19 }
 0x14b   : > { %v430_v24 = vmax.f32 %v414_v21, 0.0  ;;  %2959 = vmatmul.mubr.msk.f32.gmra.mrb[10].mxu1 %vm446_vm1, %v428_v18 }
 0x14c   : > { %v429_v25 = vmax.f32 %v413_v23, 0.0  ;;  %v3687_v26 = vpop.f32.mrb[14].mxu0 }
 0x14d   : > { %v416_v27 = vadd.f32 %v3687_v26, %v2601_v47  ;;  %v3690_v28 = vpop.f32.mrb[15].mxu0 }
 0x14e   : > { %v415_v29 = vadd.f32 %v2601_v47, %v3690_v28  ;;  %2961 = vmatprep.mubr.msk.f32.mxu1 %vm446_vm1, %v429_v25 }
 0x14f   : > { %v432_v30 = vmax.f32 %v416_v27, 0.0  ;;  %2962 = vmatmul.mubr.msk.f32.gmra.mrb[12].mxu1 %vm446_vm1, %v430_v24 }
 0x150   : > { %v431_v31 = vmax.f32 %v415_v29, 0.0 }
 0x152   : > { %2964 = vmatprep.mubr.msk.f32.mxu1 %vm446_vm1, %v431_v31 }
 0x153   : > { %2965 = vmatmul.mubr.msk.f32.gmra.mrb[14].mxu1 %vm446_vm1, %v432_v30 }
 0x20a   : > { %v2945_v36 = vpop.f32.mrb[0].mxu1 }
 0x20b   : > { %v567_v37 = vadd.f32 %v2945_v36, %v2602_v35  ;;  %v561_v38 = vpop.f32.mrb[1].mxu1 }
 0x20c   : > { %v562_v39 = vadd.f32 %v2602_v35, %v561_v38 }
 0x20d   : > { %v641_v42 = vmax.f32 %v567_v37, 0.0  ;;  %v2619_v37 = vld [vmem:[#allocation4 + $0x13a] ss:$0 sm:$0xff] }
 0x20e   : > { %v640_v40 = vmax.f32 %v562_v39, 0.0  ;;  %v2948_v41 = vpop.f32.mrb[2].mxu1 }
 0x20f   : > { %v577_v43 = vadd.f32 %v2948_v41, %v2602_v35  ;;  %v571_v44 = vpop.f32.mrb[3].mxu1 }
 0x210   : > { %v572_v45 = vadd.f32 %v2602_v35, %v571_v44  ;;  %2983 = vmatprep.mubr.msk.f32.mxu0 %vm446_vm1, %v640_v40 }
 0x211   : > { %v643_v46 = vmax.f32 %v577_v43, 0.0  ;;  %2984 = vmatmul.mubr.msk.f32.vlgmr.msra.gmra.mrb[16].mxu0 %vm446_vm1, %v641_v42 }
 0x212   : > { %v642_v47 = vmax.f32 %v572_v45, 0.0  ;;  %v2951_v49 = vpop.f32.mrb[4].mxu1 }
 0x213   : > { %v587_v51 = vadd.f32 %v2951_v49, %v2602_v35  ;;  %v581_v53 = vpop.f32.mrb[5].mxu1 }
 0x214   : > { %v582_v54 = vadd.f32 %v2602_v35, %v581_v53  ;;  %2986 = vmatprep.mubr.msk.f32.mxu0 %vm446_vm1, %v642_v47 }
 0x215   : > { %v645_v55 = vmax.f32 %v587_v51, 0.0  ;;  %2987 = vmatmul.mubr.msk.f32.gmra.mrb[18].mxu0 %vm446_vm1, %v643_v46 }
 0x216   : > { %v644_v57 = vmax.f32 %v582_v54, 0.0  ;;  %v2954_v58 = vpop.f32.mrb[6].mxu1 }
 0x217   : > { %v597_v59 = vadd.f32 %v2954_v58, %v2602_v35  ;;  %v591_v61 = vpop.f32.mrb[7].mxu1 }
 0x218   : > { %v592_v63 = vadd.f32 %v2602_v35, %v591_v61  ;;  %2989 = vmatprep.mubr.msk.f32.mxu0 %vm446_vm1, %v644_v57 }
 0x219   : > { %v647_v0 = vmax.f32 %v597_v59, 0.0  ;;  %2990 = vmatmul.mubr.msk.f32.gmra.mrb[20].mxu0 %vm446_vm1, %v645_v55 }
 0x21a   : > { %v646_v1 = vmax.f32 %v592_v63, 0.0  ;;  %v2957_v3 = vpop.f32.mrb[8].mxu1 }
 0x21b   : > { %v607_v5 = vadd.f32 %v2957_v3, %v2602_v35  ;;  %v601_v6 = vpop.f32.mrb[9].mxu1 }
 0x21c   : > { %v602_v7 = vadd.f32 %v2602_v35, %v601_v6  ;;  %2992 = vmatprep.mubr.msk.f32.mxu0 %vm446_vm1, %v646_v1 }
 0x21d   : > { %v649_v9 = vmax.f32 %v607_v5, 0.0  ;;  %2993 = vmatmul.mubr.msk.f32.gmra.mrb[22].mxu0 %vm446_vm1, %v647_v0 }
 0x21e   : > { %v648_v11 = vmax.f32 %v602_v7, 0.0  ;;  %v2960_v12 = vpop.f32.mrb[10].mxu1 }
 0x21f   : > { %v617_v13 = vadd.f32 %v2960_v12, %v2602_v35  ;;  %v611_v15 = vpop.f32.mrb[11].mxu1 }
 0x220   : > { %v612_v17 = vadd.f32 %v2602_v35, %v611_v15  ;;  %2995 = vmatprep.mubr.msk.f32.mxu0 %vm446_vm1, %v648_v11 }
 0x221   : > { %v651_v18 = vmax.f32 %v617_v13, 0.0  ;;  %2996 = vmatmul.mubr.msk.f32.gmra.mrb[24].mxu0 %vm446_vm1, %v649_v9 }
 0x222   : > { %v650_v19 = vmax.f32 %v612_v17, 0.0  ;;  %v2963_v21 = vpop.f32.mrb[12].mxu1  ;;  %v2652_v17 = vld [vmem:[#allocation4 + $0x13b] ss:$0 sm:$0xff] }
 0x223   : > { %v627_v23 = vadd.f32 %v2963_v21, %v2602_v35  ;;  %v621_v24 = vpop.f32.mrb[13].mxu1  ;;  %1144 = vrot.lane.b32.xlu1 %v2652_v17, %s3447_s14 }
 0x224   : > { %v622_v25 = vadd.f32 %v2602_v35, %v621_v24  ;;  %2998 = vmatprep.mubr.msk.f32.mxu0 %vm446_vm1, %v650_v19 }
 0x225   : > { %v653_v27 = vmax.f32 %v627_v23, 0.0  ;;  %2999 = vmatmul.mubr.msk.f32.gmra.mrb[26].mxu0 %vm446_vm1, %v651_v18 }
 0x226   : > { %v652_v29 = vmax.f32 %v622_v25, 0.0  ;;  %v2966_v30 = vpop.f32.mrb[14].mxu1 }
 0x227   : > { %v637_v31 = vadd.f32 %v2966_v30, %v2602_v35  ;;  %v631_v32 = vpop.f32.mrb[15].mxu1 }
 0x228   : > { %v632_v33 = vadd.f32 %v2602_v35, %v631_v32  ;;  %3001 = vmatprep.mubr.msk.f32.mxu0 %vm446_vm1, %v652_v29 }
 0x229   : > { %v655_v34 = vmax.f32 %v637_v31, 0.0  ;;  %3002 = vmatmul.mubr.msk.f32.gmra.mrb[28].mxu0 %vm446_vm1, %v653_v27 }
 0x22a   : > { %v654_v36 = vmax.f32 %v632_v33, 0.0 }
 0x22c   : > { %3004 = vmatprep.mubr.msk.f32.mxu0 %vm446_vm1, %v654_v36 }
 0x22d   : > { %3005 = vmatmul.mubr.msk.f32.gmra.mrb[30].mxu0 %vm446_vm1, %v655_v34 }
 0x2e4   : > { %v2985_v38 = vpop.f32.mrb[16].mxu0 }
 0x2e5   : > { %v783_v39 = vpop.f32.mrb[17].mxu0  ;;  %v3715_v41 = vadd.f32 %v2985_v38, %v2619_v37  ;;  %v1180_v38 = vld [vmem:[#allocation4 + $0xc0] sm:$0xff] }
 0x2e6   : > { %v3713_v40 = vadd.f32 %v2619_v37, %v783_v39  ;;  %v1181_v39 = vld [vmem:[#allocation4 + $0xc8] sm:$0xff] }
 0x2e8   : > { %v2988_v42 = vpop.f32.mrb[18].mxu0  ;;  %3011 = vmatprep.mubr.msk.f32.mxu1 %vm864_vm2, %v3713_v40 }
 0x2e9   : > { %v793_v35 = vpop.f32.mrb[19].mxu0  ;;  %3012 = vmatmul.mubr.msk.f32.vlgmr.msra.gmra.mrb[16].mxu1 %vm864_vm2, %v3715_v41  ;;  %v3723_v44 = vadd.f32 %v2988_v42, %v2619_v37 }
 0x2ea   : > { %v3721_v43 = vadd.f32 %v2619_v37, %v793_v35 }
 0x2ec   : > { %v2991_v45 = vpop.f32.mrb[20].mxu0  ;;  %3014 = vmatprep.mubr.msk.f32.mxu1 %vm864_vm2, %v3721_v43 }
 0x2ed   : > { %v3727_v46 = vadd.f32 %v2991_v45, %v2619_v37  ;;  %v803_v47 = vpop.f32.mrb[21].mxu0  ;;  %3015 = vmatmul.mubr.msk.f32.gmra.mrb[18].mxu1 %vm864_vm2, %v3723_v44  ;;  %v1182_v45 = vld [vmem:[#allocation4 + $0xd0] sm:$0xff] }
 0x2ee   : > { %v3731_v49 = vadd.f32 %v2619_v37, %v803_v47 }
 0x2f0   : > { %v2994_v51 = vpop.f32.mrb[22].mxu0  ;;  %3017 = vmatprep.mubr.msk.f32.mxu1 %vm864_vm2, %v3731_v49 }
 0x2f1   : > { %v3735_v53 = vadd.f32 %v2994_v51, %v2619_v37  ;;  %v813_v54 = vpop.f32.mrb[23].mxu0  ;;  %3018 = vmatmul.mubr.msk.f32.gmra.mrb[20].mxu1 %vm864_vm2, %v3727_v46  ;;  %v3211_v51 = vpack.c.bf16 %v1182_v45, %v1181_v39 }
 0x2f2   : > { %v3739_v55 = vadd.f32 %v2619_v37, %v813_v54  ;;  %v3794_v54 = vpop.permute.xlu1 %1144 }
 0x2f4   : > { %v2997_v57 = vpop.f32.mrb[24].mxu0  ;;  %3020 = vmatprep.mubr.msk.f32.mxu1 %vm864_vm2, %v3739_v55 }
 0x2f5   : > { %v3743_v58 = vadd.f32 %v2997_v57, %v2619_v37  ;;  %v823_v59 = vpop.f32.mrb[25].mxu0  ;;  %3021 = vmatmul.mubr.msk.f32.gmra.mrb[22].mxu1 %vm864_vm2, %v3735_v53 }
 0x2f6   : > { %v3747_v61 = vadd.f32 %v2619_v37, %v823_v59 }
 0x2f8   : > { %v3000_v63 = vpop.f32.mrb[26].mxu0  ;;  %3023 = vmatprep.mubr.msk.f32.mxu1 %vm864_vm2, %v3747_v61 }
 0x2f9   : > { %v3751_v0 = vadd.f32 %v3000_v63, %v2619_v37  ;;  %v833_v1 = vpop.f32.mrb[27].mxu0  ;;  %3024 = vmatmul.mubr.msk.f32.gmra.mrb[24].mxu1 %vm864_vm2, %v3743_v58 }
 0x2fa   : > { %v3755_v3 = vadd.f32 %v2619_v37, %v833_v1 }
 0x2fc   : > { %v3003_v5 = vpop.f32.mrb[28].mxu0  ;;  %3026 = vmatprep.mubr.msk.f32.mxu1 %vm864_vm2, %v3755_v3 }
 0x2fd   : > { %v3759_v6 = vadd.f32 %v3003_v5, %v2619_v37  ;;  %v843_v7 = vpop.f32.mrb[29].mxu0  ;;  %3027 = vmatmul.mubr.msk.f32.gmra.mrb[26].mxu1 %vm864_vm2, %v3751_v0 }
 0x2fe   : > { %v3763_v9 = vadd.f32 %v2619_v37, %v843_v7 }
 0x300   : > { %v3006_v11 = vpop.f32.mrb[30].mxu0  ;;  %3029 = vmatprep.mubr.msk.f32.mxu1 %vm864_vm2, %v3763_v9 }
 0x301   : > { %v3767_v12 = vadd.f32 %v3006_v11, %v2619_v37  ;;  %v853_v13 = vpop.f32.mrb[31].mxu0  ;;  %3030 = vmatmul.mubr.msk.f32.gmra.mrb[28].mxu1 %vm864_vm2, %v3759_v6 }
 0x302   : > { %v3771_v15 = vadd.f32 %v2619_v37, %v853_v13  ;;  %v1179_v37 = vld [vmem:[#allocation4 + $0xb8] sm:$0xff] }
 0x303   : > { %v3207_v35 = vpack.c.bf16 %v1180_v38, %v1179_v37 }
 0x304   : > { %3032 = vmatprep.mubr.msk.f32.mxu1 %vm864_vm2, %v3771_v15 }
 0x305   : > { %3033 = vmatmul.mubr.msk.f32.gmra.mrb[30].mxu1 %vm864_vm2, %v3767_v12  ;;  %3208 = vmatprep.subr.bf16.mxu0 %v3207_v35 }
 0x306   : > { %3210 = vmatpush3.bf16.msra.mxu0 %v3207_v35 }
 0x307   : > { %3212 = vmatprep.subr.bf16.mxu0 %v3211_v51 }
 0x30a   : > { %3214 = vmatpush3.bf16.msra.mxu0 %v3211_v51 }
 0x3bc   : > { %v3013_v18 = vpop.f32.mrb[16].mxu1 }
 0x3bd   : > { %v979_v19 = vpop.f32.mrb[17].mxu1 }
 0x3be   : > { %1074 = vrot.lane.b32.xlu0 %v979_v19, %s3447_s14 }
 0x3c0   : > { %v3016_v21 = vpop.f32.mrb[18].mxu1 }
 0x3c1   : > { %v989_v23 = vpop.f32.mrb[19].mxu1 }
 0x3c2   : > { %1076 = vrot.lane.b32.xlu0 %v3013_v18, %s3447_s14  ;;  %1078 = vrot.lane.b32.xlu1 %v989_v23, %s3447_s14 }
 0x3c4   : > { %v3019_v24 = vpop.f32.mrb[20].mxu1 }
 0x3c5   : > { %v999_v25 = vpop.f32.mrb[21].mxu1 }
 0x3c6   : > { %1080 = vrot.lane.b32.xlu0 %v3016_v21, %s3447_s14  ;;  %1082 = vrot.lane.b32.xlu1 %v999_v25, %s3447_s14 }
 0x3c8   : > { %v3022_v27 = vpop.f32.mrb[22].mxu1 }
 0x3c9   : > { %v1009_v29 = vpop.f32.mrb[23].mxu1 }
 0x3ca   : > { %1084 = vrot.lane.b32.xlu0 %v3019_v24, %s3447_s14  ;;  %1086 = vrot.lane.b32.xlu1 %v1009_v29, %s3447_s14 }
 0x3cc   : > { %v3025_v30 = vpop.f32.mrb[24].mxu1 }
 0x3cd   : > { %v1019_v31 = vpop.f32.mrb[25].mxu1 }
 0x3ce   : > { %1088 = vrot.lane.b32.xlu0 %v3022_v27, %s3447_s14  ;;  %1090 = vrot.lane.b32.xlu1 %v1019_v31, %s3447_s14 }
 0x3d0   : > { %v3028_v32 = vpop.f32.mrb[26].mxu1 }
 0x3d1   : > { %v1029_v33 = vpop.f32.mrb[27].mxu1 }
 0x3d2   : > { %1092 = vrot.lane.b32.xlu0 %v3025_v30, %s3447_s14  ;;  %1094 = vrot.lane.b32.xlu1 %v1029_v33, %s3447_s14 }
 0x3d4   : > { %v3031_v34 = vpop.f32.mrb[28].mxu1 }
 0x3d5   : > { %v1039_v36 = vpop.f32.mrb[29].mxu1 }
 0x3d6   : > { %1096 = vrot.lane.b32.xlu0 %v3028_v32, %s3447_s14  ;;  %1098 = vrot.lane.b32.xlu1 %v1039_v36, %s3447_s14 }
 0x3d8   : > { %v3034_v42 = vpop.f32.mrb[30].mxu1 }
 0x3d9   : > { %v1049_v47 = vpop.f32.mrb[31].mxu1 }
 0x3da   : > { %1100 = vrot.lane.b32.xlu0 %v3031_v34, %s3447_s14  ;;  %1102 = vrot.lane.b32.xlu1 %v1049_v47, %s3447_s14 }
 0x3de   : > { %1104 = vrot.lane.b32.xlu0 %v3034_v42, %s3447_s14 }
 0x430   : > { %v1075_v57 = vpop.permute.xlu0 %1074 }
 0x431   : > { %v1122_v59 = vadd.f32 %v1075_v57, %v3636_v50 }
 0x433   : > { %v1147_v63 = vadd.f32 %v3794_v54, %v1122_v59 }
 0x434   : > { %v1077_v1 = vpop.permute.xlu0 %1076  ;;  %v1079_v5 = vpop.permute.xlu1 %1078 }
 0x435   : > { %v1123_v7 = vadd.f32 %v3633_v48, %v1077_v1  ;;  %v1124_v11 = vadd.f32 %v1079_v5, %v3642_v56  ;;  %v1163_v13 = vmax.f32 %v1147_v63, 0.0 }
 0x437   : > { %v1148_v17 = vadd.f32 %v3794_v54, %v1123_v7  ;;  %v1149_v18 = vadd.f32 %v3794_v54, %v1124_v11  ;;  %1204 = vrot.lane.b32.xlu1 %v1163_v13, %s3447_s14  ;;  %v1430_v13 = vld [vmem:[#allocation4 + $0xd8] sm:$0xff] }
 0x438   : > { %v1081_v19 = vpop.permute.xlu0 %1080  ;;  %v1083_v21 = vpop.permute.xlu1 %1082 }
 0x439   : > { %v1125_v23 = vadd.f32 %v3639_v52, %v1081_v19  ;;  %v1126_v50 = vadd.f32 %v1083_v21, %v3650_v62  ;;  %v1164_v24 = vmax.f32 %v1148_v17, 0.0  ;;  %v1165_v25 = vmax.f32 %v1149_v18, 0.0  ;;  %v1432_v17 = vld [vmem:[#allocation4 + $0xe8] sm:$0xff] }
 0x43b   : > { %v1150_v27 = vadd.f32 %v3794_v54, %v1125_v23  ;;  %v1151_v48 = vadd.f32 %v3794_v54, %v1126_v50  ;;  %1206 = vrot.lane.b32.xlu0 %v1164_v24, %s3447_s14  ;;  %1208 = vrot.lane.b32.xlu1 %v1165_v25, %s3447_s14  ;;  %v1433_v23 = vld [vmem:[#allocation4 + $0xf0] sm:$0xff] }
 0x43c   : > { %v1085_v56 = vpop.permute.xlu0 %1084  ;;  %v1087_v29 = vpop.permute.xlu1 %1086 }
 0x43d   : > { %v1127_v30 = vadd.f32 %v3647_v60, %v1085_v56  ;;  %v1128_v31 = vadd.f32 %v1087_v29, %v3658_v4  ;;  %v1166_v32 = vmax.f32 %v1150_v27, 0.0  ;;  %v1167_v52 = vmax.f32 %v1151_v48, 0.0 }
 0x43f   : > { %v1152_v62 = vadd.f32 %v3794_v54, %v1127_v30  ;;  %v1153_v33 = vadd.f32 %v3794_v54, %v1128_v31  ;;  %1210 = vrot.lane.b32.xlu0 %v1166_v32, %s3447_s14  ;;  %1212 = vrot.lane.b32.xlu1 %v1167_v52, %s3447_s14 }
 0x440   : > { %v1089_v34 = vpop.permute.xlu0 %1088  ;;  %v1091_v36 = vpop.permute.xlu1 %1090 }
 0x441   : > { %v1129_v37 = vadd.f32 %v3655_v2, %v1089_v34  ;;  %v1130_v38 = vadd.f32 %v1091_v36, %v3666_v10  ;;  %v1168_v39 = vmax.f32 %v1152_v62, 0.0  ;;  %v1169_v60 = vmax.f32 %v1153_v33, 0.0 }
 0x443   : > { %v1154_v4 = vadd.f32 %v3794_v54, %v1129_v37  ;;  %v1155_v42 = vadd.f32 %v3794_v54, %v1130_v38  ;;  %1214 = vrot.lane.b32.xlu0 %v1168_v39, %s3447_s14  ;;  %1216 = vrot.lane.b32.xlu1 %v1169_v60, %s3447_s14 }
 0x444   : > { %v1093_v35 = vpop.permute.xlu0 %1092  ;;  %v1095_v45 = vpop.permute.xlu1 %1094 }
 0x445   : > { %v1131_v47 = vadd.f32 %v3663_v8, %v1093_v35  ;;  %v1132_v51 = vadd.f32 %v1095_v45, %v3674_v16  ;;  %v1170_v57 = vmax.f32 %v1154_v4, 0.0  ;;  %v1171_v2 = vmax.f32 %v1155_v42, 0.0  ;;  %v1431_v16 = vld [vmem:[#allocation4 + $0xe0] sm:$0xff] }
 0x446   : > { %v3215_v21 = vpack.c.bf16 %v1431_v16, %v1430_v13 }
 0x447   : > { %v1156_v10 = vadd.f32 %v3794_v54, %v1131_v47  ;;  %v1157_v59 = vadd.f32 %v3794_v54, %v1132_v51  ;;  %1218 = vrot.lane.b32.xlu0 %v1170_v57, %s3447_s14  ;;  %1220 = vrot.lane.b32.xlu1 %v1171_v2, %s3447_s14  ;;  %v2653_v57 = vld [vmem:[#allocation4 + $0x13c] ss:$0 sm:$0xff] }
 0x448   : > { %v1097_v63 = vpop.permute.xlu0 %1096  ;;  %v1099_v1 = vpop.permute.xlu1 %1098  ;;  %3216 = vmatprep.subr.bf16.mxu1 %v3215_v21 }
 0x449   : > { %v1133_v5 = vadd.f32 %v3671_v14, %v1097_v63  ;;  %v1134_v7 = vadd.f32 %v1099_v1, %v3682_v22  ;;  %v1172_v11 = vmax.f32 %v1156_v10, 0.0  ;;  %v1173_v8 = vmax.f32 %v1157_v59, 0.0  ;;  %3218 = vmatpush3.bf16.msra.mxu1 %v3215_v21 }
 0x44a   : > { %v3219_v14 = vpack.c.bf16 %v1433_v23, %v1432_v17 }
 0x44b   : > { %v1158_v18 = vadd.f32 %v3794_v54, %v1133_v5  ;;  %v1159_v19 = vadd.f32 %v3794_v54, %v1134_v7  ;;  %1222 = vrot.lane.b32.xlu0 %v1172_v11, %s3447_s14  ;;  %1224 = vrot.lane.b32.xlu1 %v1173_v8, %s3447_s14 }
 0x44c   : > { %v1101_v50 = vpop.permute.xlu0 %1100  ;;  %v1103_v24 = vpop.permute.xlu1 %1102  ;;  %3220 = vmatprep.subr.bf16.mxu1 %v3219_v14 }
 0x44d   : > { %v1135_v22 = vadd.f32 %v3679_v20, %v1101_v50  ;;  %v1136_v25 = vadd.f32 %v1103_v24, %v3690_v28  ;;  %v1174_v27 = vmax.f32 %v1158_v18, 0.0  ;;  %v1175_v48 = vmax.f32 %v1159_v19, 0.0  ;;  %3222 = vmatpush3.bf16.msra.mxu1 %v3219_v14 }
 0x44f   : > { %v1160_v56 = vadd.f32 %v3794_v54, %v1135_v22  ;;  %v1161_v29 = vadd.f32 %v3794_v54, %v1136_v25  ;;  %1226 = vrot.lane.b32.xlu0 %v1174_v27, %s3447_s14  ;;  %1228 = vrot.lane.b32.xlu1 %v1175_v48, %s3447_s14 }
 0x450   : > { %v1105_v30 = vpop.permute.xlu0 %1104 }
 0x451   : > { %v1177_v31 = vmax.f32 %v1161_v29, 0.0  ;;  %v1137_v32 = vadd.f32 %v3687_v26, %v1105_v30  ;;  %v1176_v20 = vmax.f32 %v1160_v56, 0.0 }
 0x453   : > { %v1162_v28 = vadd.f32 %v3794_v54, %v1137_v32  ;;  %1230 = vrot.lane.b32.xlu0 %v1176_v20, %s3447_s14  ;;  %1232 = vrot.lane.b32.xlu1 %v1177_v31, %s3447_s14 }
 0x455   : > { %v1178_v52 = vmax.f32 %v1162_v28, 0.0 }
 0x457   : > { %1234 = vrot.lane.b32.xlu0 %v1178_v52, %s3447_s14 }
 0x4a9   : > { %v1205_v62 = vpop.permute.xlu1 %1204 }
 0x4aa   : > { %3043 = vmatprep.mubr.msk.f32.mxu0 %vm1236_vm3, %v1205_v62 }
 0x4ad   : > { %v1207_v33 = vpop.permute.xlu0 %1206  ;;  %v1209_v34 = vpop.permute.xlu1 %1208 }
 0x4ae   : > { %3044 = vmatmul.mubr.msk.f32.vlgmr.msra.gmra.mrb[32].mxu0 %vm1236_vm3, %v1207_v33 }
 0x4af   : > { %3046 = vmatprep.mubr.msk.f32.mxu0 %vm1236_vm3, %v1209_v34 }
 0x4b1   : > { %v1211_v26 = vpop.permute.xlu0 %1210  ;;  %v1213_v36 = vpop.permute.xlu1 %1212 }
 0x4b2   : > { %3047 = vmatmul.mubr.msk.f32.gmra.mrb[34].mxu0 %vm1236_vm3, %v1211_v26 }
 0x4b3   : > { %3049 = vmatprep.mubr.msk.f32.mxu0 %vm1236_vm3, %v1213_v36 }
 0x4b5   : > { %v1215_v54 = vpop.permute.xlu0 %1214  ;;  %v1217_v37 = vpop.permute.xlu1 %1216 }
 0x4b6   : > { %3050 = vmatmul.mubr.msk.f32.gmra.mrb[36].mxu0 %vm1236_vm3, %v1215_v54 }
 0x4b7   : > { %3052 = vmatprep.mubr.msk.f32.mxu0 %vm1236_vm3, %v1217_v37 }
 0x4b9   : > { %v1219_v38 = vpop.permute.xlu0 %1218  ;;  %v1221_v39 = vpop.permute.xlu1 %1220 }
 0x4ba   : > { %3053 = vmatmul.mubr.msk.f32.gmra.mrb[38].mxu0 %vm1236_vm3, %v1219_v38 }
 0x4bb   : > { %3055 = vmatprep.mubr.msk.f32.mxu0 %vm1236_vm3, %v1221_v39 }
 0x4bd   : > { %v1223_v60 = vpop.permute.xlu0 %1222  ;;  %v1225_v4 = vpop.permute.xlu1 %1224 }
 0x4be   : > { %3056 = vmatmul.mubr.msk.f32.gmra.mrb[40].mxu0 %vm1236_vm3, %v1223_v60 }
 0x4bf   : > { %3058 = vmatprep.mubr.msk.f32.mxu0 %vm1236_vm3, %v1225_v4 }
 0x4c1   : > { %v1227_v42 = vpop.permute.xlu0 %1226  ;;  %v1229_v35 = vpop.permute.xlu1 %1228 }
 0x4c2   : > { %3059 = vmatmul.mubr.msk.f32.gmra.mrb[42].mxu0 %vm1236_vm3, %v1227_v42 }
 0x4c3   : > { %3061 = vmatprep.mubr.msk.f32.mxu0 %vm1236_vm3, %v1229_v35 }
 0x4c5   : > { %v1231_v45 = vpop.permute.xlu0 %1230  ;;  %v1233_v47 = vpop.permute.xlu1 %1232 }
 0x4c6   : > { %3062 = vmatmul.mubr.msk.f32.gmra.mrb[44].mxu0 %vm1236_vm3, %v1231_v45 }
 0x4c7   : > { %3064 = vmatprep.mubr.msk.f32.mxu0 %vm1236_vm3, %v1233_v47 }
 0x4c9   : > { %v1235_v51 = vpop.permute.xlu0 %1234 }
 0x4ca   : > { %3065 = vmatmul.mubr.msk.f32.gmra.mrb[46].mxu0 %vm1236_vm3, %v1235_v51 }
 0x581   : > { %v3045_v2 = vpop.f32.mrb[32].mxu0 }
 0x582   : > { %v1341_v10 = vadd.f32 %v3045_v2, %v2653_v57  ;;  %v1335_v59 = vpop.f32.mrb[33].mxu0 }
 0x583   : > { %v1336_v63 = vadd.f32 %v2653_v57, %v1335_v59 }
 0x584   : > { %v1415_v7 = vmax.f32 %v1341_v10, 0.0  ;;  %v3876_v10 = vld [vmem:[#allocation4 + $0x13d] ss:$0 sm:$0xff] }
 0x585   : > { %v1414_v1 = vmax.f32 %v1336_v63, 0.0  ;;  %v3048_v5 = vpop.f32.mrb[34].mxu0 }
 0x586   : > { %v1351_v11 = vadd.f32 %v3048_v5, %v2653_v57  ;;  %v1345_v8 = vpop.f32.mrb[35].mxu0 }
 0x587   : > { %v1346_v13 = vadd.f32 %v2653_v57, %v1345_v8  ;;  %3075 = vmatprep.mubr.msk.f32.mxu1 %vm1236_vm3, %v1414_v1 }
 0x588   : > { %3076 = vmatmul.mubr.msk.f32.vlgmr.msra.gmra.mrb[32].mxu1 %vm1236_vm3, %v1415_v7  ;;  %v1417_v18 = vmax.f32 %v1351_v11, 0.0 }
 0x589   : > { %v1416_v16 = vmax.f32 %v1346_v13, 0.0  ;;  %v3051_v17 = vpop.f32.mrb[36].mxu0 }
 0x58a   : > { %v1361_v19 = vadd.f32 %v3051_v17, %v2653_v57  ;;  %v1355_v21 = vpop.f32.mrb[37].mxu0 }
 0x58b   : > { %v1356_v23 = vadd.f32 %v2653_v57, %v1355_v21  ;;  %3078 = vmatprep.mubr.msk.f32.mxu1 %vm1236_vm3, %v1416_v16 }
 0x58c   : > { %3079 = vmatmul.mubr.msk.f32.gmra.mrb[34].mxu1 %vm1236_vm3, %v1417_v18  ;;  %v1419_v14 = vmax.f32 %v1361_v19, 0.0 }
 0x58d   : > { %v1418_v50 = vmax.f32 %v1356_v23, 0.0  ;;  %v3054_v24 = vpop.f32.mrb[38].mxu0 }
 0x58e   : > { %v1371_v22 = vadd.f32 %v3054_v24, %v2653_v57  ;;  %v1365_v25 = vpop.f32.mrb[39].mxu0 }
 0x58f   : > { %v1366_v27 = vadd.f32 %v2653_v57, %v1365_v25  ;;  %3081 = vmatprep.mubr.msk.f32.mxu1 %vm1236_vm3, %v1418_v50 }
 0x590   : > { %3082 = vmatmul.mubr.msk.f32.gmra.mrb[36].mxu1 %vm1236_vm3, %v1419_v14  ;;  %v1421_v29 = vmax.f32 %v1371_v22, 0.0 }
 0x591   : > { %v1420_v48 = vmax.f32 %v1366_v27, 0.0  ;;  %v3057_v56 = vpop.f32.mrb[40].mxu0 }
 0x592   : > { %v1381_v30 = vadd.f32 %v3057_v56, %v2653_v57  ;;  %v1375_v31 = vpop.f32.mrb[41].mxu0 }
 0x593   : > { %v1376_v32 = vadd.f32 %v2653_v57, %v1375_v31  ;;  %3084 = vmatprep.mubr.msk.f32.mxu1 %vm1236_vm3, %v1420_v48 }
 0x594   : > { %3085 = vmatmul.mubr.msk.f32.gmra.mrb[38].mxu1 %vm1236_vm3, %v1421_v29  ;;  %v1423_v52 = vmax.f32 %v1381_v30, 0.0 }
 0x595   : > { %v1422_v20 = vmax.f32 %v1376_v32, 0.0  ;;  %v3060_v28 = vpop.f32.mrb[42].mxu0 }
 0x596   : > { %v1391_v62 = vadd.f32 %v3060_v28, %v2653_v57  ;;  %v1385_v33 = vpop.f32.mrb[43].mxu0 }
 0x597   : > { %v1386_v34 = vadd.f32 %v2653_v57, %v1385_v33  ;;  %3087 = vmatprep.mubr.msk.f32.mxu1 %vm1236_vm3, %v1422_v20 }
 0x598   : > { %3088 = vmatmul.mubr.msk.f32.gmra.mrb[40].mxu1 %vm1236_vm3, %v1423_v52  ;;  %v1425_v54 = vmax.f32 %v1391_v62, 0.0 }
 0x599   : > { %v1424_v26 = vmax.f32 %v1386_v34, 0.0  ;;  %v3063_v36 = vpop.f32.mrb[44].mxu0 }
 0x59a   : > { %v1401_v37 = vadd.f32 %v3063_v36, %v2653_v57  ;;  %v1395_v38 = vpop.f32.mrb[45].mxu0 }
 0x59b   : > { %v1396_v39 = vadd.f32 %v2653_v57, %v1395_v38  ;;  %3090 = vmatprep.mubr.msk.f32.mxu1 %vm1236_vm3, %v1424_v26 }
 0x59c   : > { %3091 = vmatmul.mubr.msk.f32.gmra.mrb[42].mxu1 %vm1236_vm3, %v1425_v54  ;;  %v1427_v42 = vmax.f32 %v1401_v37, 0.0 }
 0x59d   : > { %v1426_v60 = vmax.f32 %v1396_v39, 0.0  ;;  %v3066_v4 = vpop.f32.mrb[46].mxu0 }
 0x59e   : > { %v1411_v35 = vadd.f32 %v3066_v4, %v2653_v57  ;;  %v1405_v45 = vpop.f32.mrb[47].mxu0 }
 0x59f   : > { %v1406_v47 = vadd.f32 %v2653_v57, %v1405_v45  ;;  %3093 = vmatprep.mubr.msk.f32.mxu1 %vm1236_vm3, %v1426_v60  ;;  %v3448_v57 = vmov 33  }
 0x5a0   : > { %3094 = vmatmul.mubr.msk.f32.gmra.mrb[44].mxu1 %vm1236_vm3, %v1427_v42  ;;  %v1429_v2 = vmax.f32 %v1411_v35, 0.0  ;;  %3295 = vset.pattern.permute.xlu0 %v3448_v57 }
 0x5a1   : > { %v1428_v51 = vmax.f32 %v1406_v47, 0.0  ;;  %3296 = vset.pattern.permute.xlu1 %v3448_v57  ;;  %v1867_v57 = vld [vmem:[#allocation4 + $0x100] sm:$0xff] }
 0x5a3   : > { %3096 = vmatprep.mubr.msk.f32.mxu1 %vm1236_vm3, %v1428_v51 }
 0x5a4   : > { %3097 = vmatmul.mubr.msk.f32.gmra.mrb[46].mxu1 %vm1236_vm3, %v1429_v2 }
 0x65b   : > { %v3077_v59 = vpop.f32.mrb[32].mxu1 }
 0x65c   : > { %v3879_v63 = vadd.f32 %v3077_v59, %v3876_v10  ;;  %v1553_v1 = vpop.f32.mrb[33].mxu1 }
 0x65d   : > { %v3882_v5 = vadd.f32 %v3876_v10, %v1553_v1  ;;  %v1866_v1 = vld [vmem:[#allocation4 + $0xf8] sm:$0xff] }
 0x65e   : > { %3297 = vrcp.f32 %v3879_v63 }
 0x65f   : > { %3299 = vrcp.f32 %v3882_v5  ;;  %v3080_v7 = vpop.f32.mrb[34].mxu1 }
 0x660   : > { %v3887_v11 = vadd.f32 %v3080_v7, %v3876_v10  ;;  %v1563_v8 = vpop.f32.mrb[35].mxu1  ;;  %v1868_v7 = vld [vmem:[#allocation4 + $0x108] sm:$0xff] }
 0x661   : > { %v3890_v13 = vadd.f32 %v3876_v10, %v1563_v8  ;;  %v3223_v8 = vpack.c.bf16 %v1867_v57, %v1866_v1  ;;  %v3337_v1 = vld [vmem:[%s3591_s26 + $0x40] sm:$0xff] }
 0x662   : > { %3301 = vrcp.f32 %v3887_v11 }
 0x663   : > { %3303 = vrcp.f32 %v3890_v13  ;;  %v3083_v16 = vpop.f32.mrb[36].mxu1  ;;  %3224 = vmatprep.subr.bf16.mxu0 %v3223_v8 }
 0x664   : > { %v3895_v17 = vadd.f32 %v3083_v16, %v3876_v10  ;;  %v1573_v18 = vpop.f32.mrb[37].mxu1  ;;  %v1869_v16 = vld [vmem:[#allocation4 + $0x110] sm:$0xff]  ;;  %3226 = vmatpush3.bf16.msra.mxu0 %v3223_v8 }
 0x665   : > { %v3898_v19 = vadd.f32 %v3876_v10, %v1573_v18  ;;  %v3227_v18 = vpack.c.bf16 %v1869_v16, %v1868_v7  ;;  %v3338_v16 = vld [vmem:[%s3591_s26 + $0x48] sm:$0xff] }
 0x666   : > { %3305 = vrcp.f32 %v3895_v17 }
 0x667   : > { %3307 = vrcp.f32 %v3898_v19  ;;  %v3086_v21 = vpop.f32.mrb[38].mxu1  ;;  %3228 = vmatprep.subr.bf16.mxu0 %v3227_v18 }
 0x668   : > { %v3298_v23 = vpop.eup %3297  ;;  %v3903_v50 = vadd.f32 %v3086_v21, %v3876_v10  ;;  %v1583_v24 = vpop.f32.mrb[39].mxu1  ;;  %3230 = vmatpush3.bf16.msra.mxu0 %v3227_v18 }
 0x669   : > { %v3300_v14 = vpop.eup %3299  ;;  %v3906_v22 = vadd.f32 %v3876_v10, %v1583_v24  ;;  %1666 = vrot.lane.b32.xlu0 %v3298_v23, %s3449_s15  ;;  %v3329_v23 = vld [vmem:[%s3591_s26 + $0x8] sm:$0xff] }
 0x66a   : > { %3309 = vrcp.f32 %v3903_v50  ;;  %1664 = vrot.lane.b32.xlu1 %v3300_v14, %s3449_s15 }
 0x66b   : > { %3311 = vrcp.f32 %v3906_v22  ;;  %v3089_v25 = vpop.f32.mrb[40].mxu1 }
 0x66c   : > { %v3302_v27 = vpop.eup %3301  ;;  %v3913_v48 = vadd.f32 %v3089_v25, %v3876_v10  ;;  %v1593_v56 = vpop.f32.mrb[41].mxu1  ;;  %v3330_v25 = vld [vmem:[%s3591_s26] sm:$0xff] }
 0x66d   : > { %v3304_v29 = vpop.eup %3303  ;;  %v3916_v30 = vadd.f32 %v3876_v10, %v1593_v56  ;;  %1670 = vrot.lane.b32.xlu0 %v3302_v27, %s3449_s15 }
 0x66e   : > { %3313 = vrcp.f32 %v3913_v48  ;;  %1668 = vrot.lane.b32.xlu1 %v3304_v29, %s3449_s15 }
 0x66f   : > { %3315 = vrcp.f32 %v3916_v30  ;;  %v3092_v31 = vpop.f32.mrb[42].mxu1 }
 0x670   : > { %v3306_v32 = vpop.eup %3305  ;;  %v3923_v20 = vadd.f32 %v3092_v31, %v3876_v10  ;;  %v1603_v28 = vpop.f32.mrb[43].mxu1  ;;  %v3331_v31 = vld [vmem:[%s3591_s26 + $0x10] sm:$0xff] }
 0x671   : > { %v3308_v52 = vpop.eup %3307  ;;  %v3926_v62 = vadd.f32 %v3876_v10, %v1603_v28  ;;  %1674 = vrot.lane.b32.xlu0 %v3306_v32, %s3449_s15 }
 0x672   : > { %3317 = vrcp.f32 %v3923_v20  ;;  %1672 = vrot.lane.b32.xlu1 %v3308_v52, %s3449_s15 }
 0x673   : > { %3319 = vrcp.f32 %v3926_v62  ;;  %v3095_v33 = vpop.f32.mrb[44].mxu1 }
 0x674   : > { %v3310_v34 = vpop.eup %3309  ;;  %v3933_v26 = vadd.f32 %v3095_v33, %v3876_v10  ;;  %v1613_v36 = vpop.f32.mrb[45].mxu1  ;;  %v3332_v33 = vld [vmem:[%s3591_s26 + $0x18] sm:$0xff] }
 0x675   : > { %v3312_v54 = vpop.eup %3311  ;;  %v3936_v37 = vadd.f32 %v3876_v10, %v1613_v36  ;;  %1678 = vrot.lane.b32.xlu0 %v3310_v34, %s3449_s15  ;;  %v3333_v36 = vld [vmem:[%s3591_s26 + $0x20] sm:$0xff] }
 0x676   : > { %3321 = vrcp.f32 %v3933_v26  ;;  %1676 = vrot.lane.b32.xlu1 %v3312_v54, %s3449_s15 }
 0x677   : > { %3323 = vrcp.f32 %v3936_v37  ;;  %v3098_v38 = vpop.f32.mrb[46].mxu1 }
 0x678   : > { %v3314_v39 = vpop.eup %3313  ;;  %v3943_v60 = vadd.f32 %v3098_v38, %v3876_v10  ;;  %v1623_v4 = vpop.f32.mrb[47].mxu1 }
 0x679   : > { %v3316_v42 = vpop.eup %3315  ;;  %v3946_v35 = vadd.f32 %v3876_v10, %v1623_v4  ;;  %1682 = vrot.lane.b32.xlu0 %v3314_v39, %s3449_s15  ;;  %v3334_v4 = vld [vmem:[%s3591_s26 + $0x28] sm:$0xff] }
 0x67a   : > { %3325 = vrcp.f32 %v3943_v60  ;;  %1680 = vrot.lane.b32.xlu1 %v3316_v42, %s3449_s15 }
 0x67b   : > { %3327 = vrcp.f32 %v3946_v35 }
 0x67c   : > { %v3318_v45 = vpop.eup %3317 }
 0x67d   : > { %v3320_v47 = vpop.eup %3319  ;;  %1686 = vrot.lane.b32.xlu0 %v3318_v45, %s3449_s15  ;;  %v3335_v45 = vld [vmem:[%s3591_s26 + $0x30] sm:$0xff] }
 0x67e   : > { %1684 = vrot.lane.b32.xlu1 %v3320_v47, %s3449_s15 }
 0x680   : > { %v3322_v51 = vpop.eup %3321 }
 0x681   : > { %v3324_v2 = vpop.eup %3323  ;;  %1690 = vrot.lane.b32.xlu0 %v3322_v51, %s3449_s15 }
 0x682   : > { %1688 = vrot.lane.b32.xlu1 %v3324_v2, %s3449_s15 }
 0x684   : > { %v3326_v10 = vpop.eup %3325 }
 0x685   : > { %v3328_v59 = vpop.eup %3327  ;;  %1694 = vrot.lane.b32.xlu0 %v3326_v10, %s3449_s15  ;;  %v3336_v10 = vld [vmem:[%s3591_s26 + $0x38] sm:$0xff] }
 0x686   : > { %1692 = vrot.lane.b32.xlu1 %v3328_v59, %s3449_s15 }
 0x6db   : > { %v1667_v21 = vpop.permute.xlu0 %1666 }
 0x6dc   : > { %v1713_v24 = vmul.f32 %v3329_v23, %v1667_v21  ;;  %v1665_v14 = vpop.permute.xlu1 %1664  ;;  %v3339_v21 = vld [vmem:[%s3591_s26 + $0x50] sm:$0xff] }
 0x6dd   : > { %v1712_v27 = vmul.f32 %v3330_v25, %v1665_v14  ;;  %v3340_v25 = vld [vmem:[%s3591_s26 + $0x58] sm:$0xff] }
 0x6de   : > { %1736 = vperm.xlu0 %3295, %v1713_v24  }
 0x6df   : > { %v1671_v56 = vpop.permute.xlu0 %1670  ;;  %1731 = vperm.xlu1 %3296, %v1712_v27  }
 0x6e0   : > { %v1669_v29 = vpop.permute.xlu1 %1668  ;;  %v1715_v34 = vmul.f32 %v3332_v33, %v1671_v56  ;;  %v3341_v56 = vld [vmem:[%s3591_s26 + $0x60] sm:$0xff] }
 0x6e1   : > { %v1714_v32 = vmul.f32 %v3331_v31, %v1669_v29 }
 0x6e3   : > { %v1675_v28 = vpop.permute.xlu0 %1674  ;;  %1741 = vperm.xlu1 %3296, %v1714_v32   ;;  %v3342_v32 = vld [vmem:[%s3591_s26 + $0x68] sm:$0xff] }
 0x6e4   : > { %v1673_v52 = vpop.permute.xlu1 %1672  ;;  %v1717_v42 = vmul.f32 %v3334_v4, %v1675_v28 }
 0x6e5   : > { %v1716_v54 = vmul.f32 %v3333_v36, %v1673_v52  ;;  %v3343_v52 = vld [vmem:[%s3591_s26 + $0x70] sm:$0xff]  ;;  %v3344_v36 = vld [vmem:[%s3591_s26 + $0x78] sm:$0xff] }
 0x6e7   : > { %v1679_v38 = vpop.permute.xlu0 %1678  ;;  %1746 = vperm.xlu1 %3296, %v1715_v34   ;;  %1751 = vperm.xlu0 %3295, %v1716_v54  }
 0x6e8   : > { %v1677_v39 = vpop.permute.xlu1 %1676  ;;  %v1719_v59 = vmul.f32 %v3336_v10, %v1679_v38  ;;  %v3990_v38 = vld [vmem:[#allocation4 + $0x13e] ss:$0 sm:$0xff] }
 0x6e9   : > { %v1718_v47 = vmul.f32 %v3335_v45, %v1677_v39  ;;  %v3992_v39 = vld [vmem:[#allocation4 + $0x13f] ss:$0 sm:$0xff] }
 0x6eb   : > { %v1683_v51 = vpop.permute.xlu0 %1682  ;;  %1756 = vperm.xlu1 %3296, %v1717_v42   ;;  %1761 = vperm.xlu0 %3295, %v1718_v47  }
 0x6ec   : > { %v1681_v2 = vpop.permute.xlu1 %1680  ;;  %v1721_v18 = vmul.f32 %v3338_v16, %v1683_v51 }
 0x6ed   : > { %v1720_v57 = vmul.f32 %v3337_v1, %v1681_v2 }
 0x6ef   : > { %v1687_v7 = vpop.permute.xlu0 %1686  ;;  %1766 = vperm.xlu1 %3296, %v1719_v59   ;;  %1771 = vperm.xlu0 %3295, %v1720_v57  }
 0x6f0   : > { %v1685_v8 = vpop.permute.xlu1 %1684  ;;  %v1723_v27 = vmul.f32 %v3340_v25, %v1687_v7 }
 0x6f1   : > { %v1722_v23 = vmul.f32 %v3339_v21, %v1685_v8 }
 0x6f3   : > { %1776 = vperm.xlu1 %3296, %v1721_v18   ;;  %1781 = vperm.xlu0 %3295, %v1722_v23   ;;  %v1691_v24 = vpop.permute.xlu0 %1690 }
 0x6f4   : > { %v1689_v14 = vpop.permute.xlu1 %1688  ;;  %v1725_v28 = vmul.f32 %v3342_v32, %v1691_v24 }
 0x6f5   : > { %v1724_v29 = vmul.f32 %v3341_v56, %v1689_v14 }
 0x6f7   : > { %1786 = vperm.xlu1 %3296, %v1723_v27   ;;  %1791 = vperm.xlu0 %3295, %v1724_v29   ;;  %v1695_v34 = vpop.permute.xlu0 %1694 }
 0x6f8   : > { %v1693_v31 = vpop.permute.xlu1 %1692  ;;  %v1727_v54 = vmul.f32 %v3344_v36, %v1695_v34 }
 0x6f9   : > { %v1726_v33 = vmul.f32 %v3343_v52, %v1693_v31 }
 0x6fb   : > { %1796 = vperm.xlu1 %3296, %v1725_v28   ;;  %1801 = vperm.xlu0 %3295, %v1726_v33  }
 0x6ff   : > { %1806 = vperm.xlu1 %3296, %v1727_v54   ;;  %2350 = vrot.lane.b32.xlu0 %v3713_v40, %s3450_s16 }
 0x703   : > { %2352 = vrot.lane.b32.xlu1 %v3715_v41, %s3450_s16  ;;  %2354 = vrot.lane.b32.xlu0 %v3721_v43, %s3450_s16 }
 0x707   : > { %2356 = vrot.lane.b32.xlu1 %v3723_v44, %s3450_s16  ;;  %2358 = vrot.lane.b32.xlu0 %v3731_v49, %s3450_s16 }
 0x70b   : > { %2360 = vrot.lane.b32.xlu1 %v3727_v46, %s3450_s16  ;;  %2362 = vrot.lane.b32.xlu0 %v3739_v55, %s3450_s16 }
 0x70f   : > { %2364 = vrot.lane.b32.xlu1 %v3735_v53, %s3450_s16  ;;  %2366 = vrot.lane.b32.xlu0 %v3747_v61, %s3450_s16 }
 0x713   : > { %2368 = vrot.lane.b32.xlu1 %v3743_v58, %s3450_s16  ;;  %2370 = vrot.lane.b32.xlu0 %v3755_v3, %s3450_s16 }
 0x717   : > { %2372 = vrot.lane.b32.xlu1 %v3751_v0, %s3450_s16  ;;  %2374 = vrot.lane.b32.xlu0 %v3763_v9, %s3450_s16 }
 0x71b   : > { %2376 = vrot.lane.b32.xlu1 %v3759_v6, %s3450_s16  ;;  %2378 = vrot.lane.b32.xlu0 %v3771_v15, %s3450_s16 }
 0x71f   : > { %2380 = vrot.lane.b32.xlu1 %v3767_v12, %s3450_s16 }
 0x75d   : > { %v1737_v4 = vpop.permute.xlu0 %1736 }
 0x75e   : > { %v1814_v42 = vmul.f32 %v3990_v38, %v1737_v4  ;;  %v1732_v45 = vpop.permute.xlu1 %1731 }
 0x75f   : > { %v1813_v47 = vmul.f32 %v3990_v38, %v1732_v45 }
 0x760   : > { %v1835_v51 = vadd.f32 %v3992_v39, %v1814_v42 }
 0x761   : > { %v1834_v2 = vadd.f32 %v3992_v39, %v1813_v47 }
 0x762   : > { %v1742_v10 = vpop.permute.xlu1 %1741  ;;  %v1851_v57 = vmax.f32 %v1835_v51, 0.0 }
 0x763   : > { %v1850_v59 = vmax.f32 %v1834_v2, 0.0  ;;  %v1815_v1 = vmul.f32 %v3990_v38, %v1742_v10 }
 0x765   : > { %v1836_v7 = vadd.f32 %v3992_v39, %v1815_v1  ;;  %3107 = vmatprep.mubr.msk.f32.mxu0 %vm1236_vm3, %v1850_v59 }
 0x766   : > { %v1752_v8 = vpop.permute.xlu0 %1751  ;;  %3108 = vmatmul.mubr.msk.f32.vlgmr.msra.gmra.mrb[48].mxu0 %vm1236_vm3, %v1851_v57  ;;  %v1747_v16 = vpop.permute.xlu1 %1746 }
 0x767   : > { %v1852_v18 = vmax.f32 %v1836_v7, 0.0  ;;  %v1817_v21 = vmul.f32 %v3990_v38, %v1752_v8  ;;  %v1816_v23 = vmul.f32 %v3990_v38, %v1747_v16 }
 0x769   : > { %v1838_v24 = vadd.f32 %v3992_v39, %v1817_v21  ;;  %v1837_v14 = vadd.f32 %v3992_v39, %v1816_v23  ;;  %3110 = vmatprep.mubr.msk.f32.mxu0 %vm1236_vm3, %v1852_v18 }
 0x76a   : > { %v1762_v25 = vpop.permute.xlu0 %1761  ;;  %v1757_v27 = vpop.permute.xlu1 %1756 }
 0x76b   : > { %v1854_v56 = vmax.f32 %v1838_v24, 0.0  ;;  %v1853_v29 = vmax.f32 %v1837_v14, 0.0  ;;  %v1819_v31 = vmul.f32 %v3990_v38, %v1762_v25  ;;  %v1818_v32 = vmul.f32 %v3990_v38, %v1757_v27 }
 0x76d   : > { %v1840_v28 = vadd.f32 %v3992_v39, %v1819_v31  ;;  %v1839_v52 = vadd.f32 %v3992_v39, %v1818_v32  ;;  %3111 = vmatmul.mubr.msk.f32.gmra.mrb[50].mxu0 %vm1236_vm3, %v1853_v29 }
 0x76e   : > { %v1772_v33 = vpop.permute.xlu0 %1771  ;;  %3113 = vmatprep.mubr.msk.f32.mxu0 %vm1236_vm3, %v1854_v56  ;;  %v1767_v34 = vpop.permute.xlu1 %1766 }
 0x76f   : > { %v1856_v36 = vmax.f32 %v1840_v28, 0.0  ;;  %v1855_v54 = vmax.f32 %v1839_v52, 0.0  ;;  %v1821_v4 = vmul.f32 %v3990_v38, %v1772_v33  ;;  %v1820_v42 = vmul.f32 %v3990_v38, %v1767_v34 }
 0x771   : > { %v1842_v45 = vadd.f32 %v3992_v39, %v1821_v4  ;;  %v1841_v47 = vadd.f32 %v3992_v39, %v1820_v42  ;;  %3114 = vmatmul.mubr.msk.f32.gmra.mrb[52].mxu0 %vm1236_vm3, %v1855_v54 }
 0x772   : > { %v1782_v51 = vpop.permute.xlu0 %1781  ;;  %3116 = vmatprep.mubr.msk.f32.mxu0 %vm1236_vm3, %v1856_v36  ;;  %v1777_v2 = vpop.permute.xlu1 %1776 }
 0x773   : > { %v1858_v10 = vmax.f32 %v1842_v45, 0.0  ;;  %v1857_v59 = vmax.f32 %v1841_v47, 0.0  ;;  %v1823_v1 = vmul.f32 %v3990_v38, %v1782_v51  ;;  %v1822_v57 = vmul.f32 %v3990_v38, %v1777_v2 }
 0x775   : > { %v1844_v7 = vadd.f32 %v3992_v39, %v1823_v1  ;;  %v1843_v8 = vadd.f32 %v3992_v39, %v1822_v57  ;;  %3117 = vmatmul.mubr.msk.f32.gmra.mrb[54].mxu0 %vm1236_vm3, %v1857_v59 }
 0x776   : > { %v1792_v16 = vpop.permute.xlu0 %1791  ;;  %3119 = vmatprep.mubr.msk.f32.mxu0 %vm1236_vm3, %v1858_v10  ;;  %v1787_v18 = vpop.permute.xlu1 %1786 }
 0x777   : > { %v1860_v21 = vmax.f32 %v1844_v7, 0.0  ;;  %v1859_v23 = vmax.f32 %v1843_v8, 0.0  ;;  %v1825_v24 = vmul.f32 %v3990_v38, %v1792_v16  ;;  %v1824_v14 = vmul.f32 %v3990_v38, %v1787_v18 }
 0x779   : > { %v1846_v25 = vadd.f32 %v3992_v39, %v1825_v24  ;;  %v1845_v27 = vadd.f32 %v3992_v39, %v1824_v14  ;;  %3120 = vmatmul.mubr.msk.f32.gmra.mrb[56].mxu0 %vm1236_vm3, %v1859_v23 }
 0x77a   : > { %v1802_v56 = vpop.permute.xlu0 %1801  ;;  %3122 = vmatprep.mubr.msk.f32.mxu0 %vm1236_vm3, %v1860_v21  ;;  %v1797_v29 = vpop.permute.xlu1 %1796 }
 0x77b   : > { %v1862_v31 = vmax.f32 %v1846_v25, 0.0  ;;  %v1861_v32 = vmax.f32 %v1845_v27, 0.0  ;;  %v1827_v28 = vmul.f32 %v3990_v38, %v1802_v56  ;;  %v1826_v52 = vmul.f32 %v3990_v38, %v1797_v29 }
 0x77d   : > { %v1848_v33 = vadd.f32 %v3992_v39, %v1827_v28  ;;  %v1847_v34 = vadd.f32 %v3992_v39, %v1826_v52  ;;  %3123 = vmatmul.mubr.msk.f32.gmra.mrb[58].mxu0 %vm1236_vm3, %v1861_v32 }
 0x77e   : > { %v2351_v36 = vpop.permute.xlu0 %2350  ;;  %3125 = vmatprep.mubr.msk.f32.mxu0 %vm1236_vm3, %v1862_v31  ;;  %v1807_v54 = vpop.permute.xlu1 %1806 }
 0x77f   : > { %v1864_v4 = vmax.f32 %v1848_v33, 0.0  ;;  %v1863_v42 = vmax.f32 %v1847_v34, 0.0  ;;  %v2398_v45 = vmul.f32 %v2351_v36, %v3713_v40  ;;  %v1828_v47 = vmul.f32 %v3990_v38, %v1807_v54 }
 0x781   : > { %v1849_v51 = vadd.f32 %v3992_v39, %v1828_v47  ;;  %3126 = vmatmul.mubr.msk.f32.gmra.mrb[60].mxu0 %vm1236_vm3, %v1863_v42  ;;  %v2414_v2 = vsel %vm864_vm2, %v2398_v45, 0.0  ;;  %v2084_v47 = vld [vmem:[#allocation4 + $0x118] sm:$0xff] }
 0x782   : > { %2415 = vadd.xlane.f32.xlu1 %v2414_v2  ;;  %v2355_v10 = vpop.permute.xlu0 %2354  ;;  %3128 = vmatprep.mubr.msk.f32.mxu0 %vm1236_vm3, %v1864_v4  ;;  %v2353_v59 = vpop.permute.xlu1 %2352 }
 0x783   : > { %v1865_v1 = vmax.f32 %v1849_v51, 0.0  ;;  %v2400_v57 = vmul.f32 %v2355_v10, %v3721_v43  ;;  %v2399_v7 = vmul.f32 %v2353_v59, %v3715_v41  ;;  %v2085_v51 = vld [vmem:[#allocation4 + $0x120] sm:$0xff]  ;;  %v2087_v10 = vld [vmem:[#allocation4 + $0x130] sm:$0xff] }
 0x784   : > { %v3231_v2 = vpack.c.bf16 %v2085_v51, %v2084_v47  ;;  %v2689_v59 = vld [vmem:[#allocation4 + $0x140] ss:$0 sm:$0xff] }
 0x785   : > { %3129 = vmatmul.mubr.msk.f32.gmra.mrb[62].mxu0 %vm1236_vm3, %v1865_v1  ;;  %v2420_v40 = vsel %vm864_vm2, %v2400_v57, 0.0  ;;  %v2417_v38 = vsel %vm864_vm2, %v2399_v7, 0.0 }
 0x786   : > { %2421 = vadd.xlane.f32.xlu1 %v2420_v40  ;;  %v2359_v39 = vpop.permute.xlu0 %2358  ;;  %2418 = vadd.xlane.f32.xlu0 %v2417_v38  ;;  %v2357_v8 = vpop.permute.xlu1 %2356 }
 0x787   : > { %v2402_v16 = vmul.f32 %v2359_v39, %v3731_v49  ;;  %v2401_v18 = vmul.f32 %v2357_v8, %v3723_v44  ;;  %3232 = vmatprep.subr.bf16.mxu1 %v3231_v2 }
 0x788   : > { %3234 = vmatpush3.bf16.msra.mxu1 %v3231_v2 }
 0x789   : > { %v2426_v21 = vsel %vm864_vm2, %v2402_v16, 0.0  ;;  %v2423_v43 = vsel %vm864_vm2, %v2401_v18, 0.0 }
 0x78a   : > { %2427 = vadd.xlane.f32.xlu1 %v2426_v21  ;;  %v2363_v41 = vpop.permute.xlu0 %2362  ;;  %2424 = vadd.xlane.f32.xlu0 %v2423_v43  ;;  %v2361_v23 = vpop.permute.xlu1 %2360 }
 0x78b   : > { %v2404_v24 = vmul.f32 %v2363_v41, %v3739_v55  ;;  %v2403_v14 = vmul.f32 %v2361_v23, %v3727_v46 }
 0x78d   : > { %v2432_v25 = vsel %vm864_vm2, %v2404_v24, 0.0  ;;  %v2429_v27 = vsel %vm864_vm2, %v2403_v14, 0.0 }
 0x78e   : > { %2433 = vadd.xlane.f32.xlu1 %v2432_v25  ;;  %v2367_v49 = vpop.permute.xlu0 %2366  ;;  %2430 = vadd.xlane.f32.xlu0 %v2429_v27  ;;  %v2365_v44 = vpop.permute.xlu1 %2364 }
 0x78f   : > { %v2406_v56 = vmul.f32 %v2367_v49, %v3747_v61  ;;  %v2405_v29 = vmul.f32 %v2365_v44, %v3735_v53 }
 0x791   : > { %v2438_v31 = vsel %vm864_vm2, %v2406_v56, 0.0  ;;  %v2435_v32 = vsel %vm864_vm2, %v2405_v29, 0.0 }
 0x792   : > { %2439 = vadd.xlane.f32.xlu1 %v2438_v31  ;;  %v2371_v55 = vpop.permute.xlu0 %2370  ;;  %2436 = vadd.xlane.f32.xlu0 %v2435_v32  ;;  %v2369_v46 = vpop.permute.xlu1 %2368 }
 0x793   : > { %v2408_v28 = vmul.f32 %v2371_v55, %v3755_v3  ;;  %v2407_v52 = vmul.f32 %v2369_v46, %v3743_v58 }
 0x795   : > { %v2444_v33 = vsel %vm864_vm2, %v2408_v28, 0.0  ;;  %v2441_v34 = vsel %vm864_vm2, %v2407_v52, 0.0 }
 0x796   : > { %2445 = vadd.xlane.f32.xlu1 %v2444_v33  ;;  %v2375_v61 = vpop.permute.xlu0 %2374  ;;  %2442 = vadd.xlane.f32.xlu0 %v2441_v34  ;;  %v2373_v53 = vpop.permute.xlu1 %2372 }
 0x797   : > { %v2410_v36 = vmul.f32 %v2375_v61, %v3763_v9  ;;  %v2409_v54 = vmul.f32 %v2373_v53, %v3751_v0  ;;  %v2086_v9 = vld [vmem:[#allocation4 + $0x128] sm:$0xff] }
 0x798   : > { %v3235_v0 = vpack.c.bf16 %v2087_v10, %v2086_v9 }
 0x799   : > { %v2450_v4 = vsel %vm864_vm2, %v2410_v36, 0.0  ;;  %v2447_v42 = vsel %vm864_vm2, %v2409_v54, 0.0 }
 0x79a   : > { %2451 = vadd.xlane.f32.xlu1 %v2450_v4  ;;  %2448 = vadd.xlane.f32.xlu0 %v2447_v42  ;;  %v2377_v3 = vpop.permute.xlu1 %2376 }
 0x79b   : > { %v2411_v58 = vmul.f32 %v2377_v3, %v3759_v6  ;;  %3236 = vmatprep.subr.bf16.mxu1 %v3235_v0 }
 0x79c   : > { %3238 = vmatpush3.bf16.msra.mxu1 %v3235_v0 }
 0x79d   : > { %v2453_v45 = vsel %vm864_vm2, %v2411_v58, 0.0 }
 0x79e   : > { %2454 = vadd.xlane.f32.xlu0 %v2453_v45 }
 0x839   : > { %v3109_v1 = vpop.f32.mrb[48].mxu0 }
 0x83a   : > { %v1995_v57 = vadd.f32 %v3109_v1, %v2689_v59  ;;  %v1989_v7 = vpop.f32.mrb[49].mxu0 }
 0x83b   : > { %v1990_v40 = vadd.f32 %v2689_v59, %v1989_v7 }
 0x83c   : > { %v2069_v6 = vmax.f32 %v1995_v57, 0.0 }
 0x83d   : > { %v2068_v38 = vmax.f32 %v1990_v40, 0.0  ;;  %v4086_v40 = vld [vmem:[#allocation4 + $0x141] ss:$0 sm:$0xff] }
 0x83f   : > { %3139 = vmatprep.mubr.msk.f32.mxu1 %vm1236_vm3, %v2068_v38 }
 0x840   : > { %v3112_v39 = vpop.f32.mrb[50].mxu0  ;;  %3140 = vmatmul.mubr.msk.f32.vlgmr.msra.gmra.mrb[48].mxu1 %vm1236_vm3, %v2069_v6 }
 0x841   : > { %v2005_v8 = vadd.f32 %v3112_v39, %v2689_v59  ;;  %v1999_v16 = vpop.f32.mrb[51].mxu0 }
 0x842   : > { %v2000_v18 = vadd.f32 %v2689_v59, %v1999_v16 }
 0x843   : > { %v2071_v41 = vmax.f32 %v2005_v8, 0.0 }
 0x844   : > { %v2070_v21 = vmax.f32 %v2000_v18, 0.0  ;;  %v3115_v43 = vpop.f32.mrb[52].mxu0 }
 0x845   : > { %v2015_v23 = vadd.f32 %v3115_v43, %v2689_v59  ;;  %v2009_v24 = vpop.f32.mrb[53].mxu0 }
 0x846   : > { %v2010_v14 = vadd.f32 %v2689_v59, %v2009_v24  ;;  %3142 = vmatprep.mubr.msk.f32.mxu1 %vm1236_vm3, %v2070_v21 }
 0x847   : > { %3143 = vmatmul.mubr.msk.f32.gmra.mrb[50].mxu1 %vm1236_vm3, %v2071_v41  ;;  %v2073_v49 = vmax.f32 %v2015_v23, 0.0 }
 0x848   : > { %v2072_v25 = vmax.f32 %v2010_v14, 0.0  ;;  %v3118_v27 = vpop.f32.mrb[54].mxu0 }
 0x849   : > { %v2025_v44 = vadd.f32 %v3118_v27, %v2689_v59  ;;  %v2019_v56 = vpop.f32.mrb[55].mxu0 }
 0x84a   : > { %v2020_v29 = vadd.f32 %v2689_v59, %v2019_v56  ;;  %3145 = vmatprep.mubr.msk.f32.mxu1 %vm1236_vm3, %v2072_v25 }
 0x84b   : > { %3146 = vmatmul.mubr.msk.f32.gmra.mrb[52].mxu1 %vm1236_vm3, %v2073_v49  ;;  %v2075_v55 = vmax.f32 %v2025_v44, 0.0 }
 0x84c   : > { %v2074_v31 = vmax.f32 %v2020_v29, 0.0  ;;  %v3121_v32 = vpop.f32.mrb[56].mxu0 }
 0x84d   : > { %v2035_v46 = vadd.f32 %v3121_v32, %v2689_v59  ;;  %v2029_v28 = vpop.f32.mrb[57].mxu0 }
 0x84e   : > { %v2030_v52 = vadd.f32 %v2689_v59, %v2029_v28  ;;  %3148 = vmatprep.mubr.msk.f32.mxu1 %vm1236_vm3, %v2074_v31 }
 0x84f   : > { %3149 = vmatmul.mubr.msk.f32.gmra.mrb[54].mxu1 %vm1236_vm3, %v2075_v55  ;;  %v2077_v61 = vmax.f32 %v2035_v46, 0.0 }
 0x850   : > { %v2076_v33 = vmax.f32 %v2030_v52, 0.0  ;;  %v3124_v34 = vpop.f32.mrb[58].mxu0 }
 0x851   : > { %v2045_v53 = vadd.f32 %v3124_v34, %v2689_v59  ;;  %v2039_v36 = vpop.f32.mrb[59].mxu0 }
 0x852   : > { %v2040_v54 = vadd.f32 %v2689_v59, %v2039_v36  ;;  %3151 = vmatprep.mubr.msk.f32.mxu1 %vm1236_vm3, %v2076_v33 }
 0x853   : > { %3152 = vmatmul.mubr.msk.f32.gmra.mrb[56].mxu1 %vm1236_vm3, %v2077_v61  ;;  %v2079_v3 = vmax.f32 %v2045_v53, 0.0 }
 0x854   : > { %v2078_v4 = vmax.f32 %v2040_v54, 0.0  ;;  %v3127_v42 = vpop.f32.mrb[60].mxu0 }
 0x855   : > { %v2055_v58 = vadd.f32 %v3127_v42, %v2689_v59  ;;  %v2049_v45 = vpop.f32.mrb[61].mxu0 }
 0x856   : > { %v2050_v47 = vadd.f32 %v2689_v59, %v2049_v45  ;;  %3154 = vmatprep.mubr.msk.f32.mxu1 %vm1236_vm3, %v2078_v4 }
 0x857   : > { %3155 = vmatmul.mubr.msk.f32.gmra.mrb[58].mxu1 %vm1236_vm3, %v2079_v3  ;;  %v2081_v9 = vmax.f32 %v2055_v58, 0.0 }
 0x858   : > { %v2080_v51 = vmax.f32 %v2050_v47, 0.0  ;;  %v3130_v2 = vpop.f32.mrb[62].mxu0 }
 0x859   : > { %v2065_v10 = vadd.f32 %v3130_v2, %v2689_v59  ;;  %v2059_v0 = vpop.f32.mrb[63].mxu0 }
 0x85a   : > { %v2060_v1 = vadd.f32 %v2689_v59, %v2059_v0  ;;  %3157 = vmatprep.mubr.msk.f32.mxu1 %vm1236_vm3, %v2080_v51 }
 0x85b   : > { %3158 = vmatmul.mubr.msk.f32.gmra.mrb[60].mxu1 %vm1236_vm3, %v2081_v9  ;;  %v2083_v7 = vmax.f32 %v2065_v10, 0.0 }
 0x85c   : > { %v2082_v57 = vmax.f32 %v2060_v1, 0.0 }
 0x85e   : > { %3160 = vmatprep.mubr.msk.f32.mxu1 %vm1236_vm3, %v2082_v57 }
 0x85f   : > { %3161 = vmatmul.mubr.msk.f32.gmra.mrb[62].mxu1 %vm1236_vm3, %v2083_v7 }
 0x913   : > { %v3141_v38 = vpop.f32.mrb[48].mxu1 }
 0x914   : > { %v2213_v6 = vadd.f32 %v3141_v38, %v4086_v40  ;;  %v2207_v39 = vpop.f32.mrb[49].mxu1 }
 0x915   : > { %v2208_v8 = vadd.f32 %v4086_v40, %v2207_v39  ;;  %v2379_v39 = vpop.permute.xlu0 %2378 }
 0x916   : > { %v2287_v59 = vmul.f32 %v2213_v6, %v3879_v63 }
 0x917   : > { %v2286_v16 = vmul.f32 %v2208_v8, %v3882_v5 }
 0x918   : > { %v2305_v18 = vsel %vm864_vm2, %v2287_v59, 0.0 }
 0x919   : > { %2306 = vadd.xlane.f32.xlu1 %v2305_v18  ;;  %v2302_v21 = vsel %vm864_vm2, %v2286_v16, 0.0  ;;  %v2381_v16 = vpop.permute.xlu1 %2380 }
 0x91a   : > { %v3144_v43 = vpop.f32.mrb[50].mxu1  ;;  %2303 = vadd.xlane.f32.xlu0 %v2302_v21 }
 0x91b   : > { %v2223_v41 = vadd.f32 %v3144_v43, %v4086_v40  ;;  %v2217_v23 = vpop.f32.mrb[51].mxu1 }
 0x91c   : > { %v2218_v24 = vadd.f32 %v4086_v40, %v2217_v23 }
 0x91d   : > { %v2289_v14 = vmul.f32 %v2223_v41, %v3887_v11  ;;  %v2419_v41 = vpop.xlane.xlu0 %2418 }
 0x91e   : > { %v3147_v25 = vpop.f32.mrb[52].mxu1  ;;  %v2288_v27 = vmul.f32 %v2218_v24, %v3890_v13 }
 0x91f   : > { %v2233_v63 = vadd.f32 %v3147_v25, %v4086_v40  ;;  %v2227_v5 = vpop.f32.mrb[53].mxu1  ;;  %v2311_v49 = vsel %vm864_vm2, %v2289_v14, 0.0 }
 0x920   : > { %v2228_v44 = vadd.f32 %v4086_v40, %v2227_v5  ;;  %2312 = vadd.xlane.f32.xlu0 %v2311_v49  ;;  %v2308_v11 = vsel %vm864_vm2, %v2288_v27, 0.0 }
 0x921   : > { %v2291_v31 = vmul.f32 %v2233_v63, %v3895_v17  ;;  %v2425_v23 = vpop.xlane.xlu0 %2424 }
 0x922   : > { %v2290_v56 = vmul.f32 %v2228_v44, %v3898_v19  ;;  %v3150_v29 = vpop.f32.mrb[54].mxu1 }
 0x923   : > { %v2243_v32 = vadd.f32 %v3150_v29, %v4086_v40  ;;  %v2237_v55 = vpop.f32.mrb[55].mxu1  ;;  %v2317_v17 = vsel %vm864_vm2, %v2291_v31, 0.0 }
 0x924   : > { %v2238_v13 = vadd.f32 %v4086_v40, %v2237_v55  ;;  %2309 = vadd.xlane.f32.xlu0 %v2308_v11  ;;  %v2314_v46 = vsel %vm864_vm2, %v2290_v56, 0.0 }
 0x925   : > { %2315 = vadd.xlane.f32.xlu1 %v2314_v46  ;;  %v2293_v33 = vmul.f32 %v2243_v32, %v3903_v50  ;;  %v2431_v14 = vpop.xlane.xlu0 %2430 }
 0x926   : > { %v2292_v28 = vmul.f32 %v2238_v13, %v3906_v22  ;;  %v3153_v52 = vpop.f32.mrb[56].mxu1 }
 0x927   : > { %v2253_v19 = vadd.f32 %v3153_v52, %v4086_v40  ;;  %v2247_v34 = vpop.f32.mrb[57].mxu1  ;;  %v2323_v50 = vsel %vm864_vm2, %v2293_v33, 0.0 }
 0x928   : > { %v2248_v61 = vadd.f32 %v4086_v40, %v2247_v34  ;;  %2318 = vadd.xlane.f32.xlu0 %v2317_v17  ;;  %v2320_v53 = vsel %vm864_vm2, %v2292_v28, 0.0 }
 0x929   : > { %2321 = vadd.xlane.f32.xlu1 %v2320_v53  ;;  %v2295_v4 = vmul.f32 %v2253_v19, %v3913_v48  ;;  %v2437_v27 = vpop.xlane.xlu0 %2436 }
 0x92a   : > { %v2294_v36 = vmul.f32 %v2248_v61, %v3916_v30  ;;  %v3156_v54 = vpop.f32.mrb[58].mxu1 }
 0x92b   : > { %v2263_v22 = vadd.f32 %v3156_v54, %v4086_v40  ;;  %v2257_v42 = vpop.f32.mrb[59].mxu1  ;;  %v2329_v48 = vsel %vm864_vm2, %v2295_v4, 0.0 }
 0x92c   : > { %v2258_v3 = vadd.f32 %v4086_v40, %v2257_v42  ;;  %2324 = vadd.xlane.f32.xlu0 %v2323_v50  ;;  %v2326_v58 = vsel %vm864_vm2, %v2294_v36, 0.0 }
 0x92d   : > { %2327 = vadd.xlane.f32.xlu1 %v2326_v58  ;;  %v2297_v51 = vmul.f32 %v2263_v22, %v3923_v20 }
 0x92e   : > { %v2296_v45 = vmul.f32 %v2258_v3, %v3926_v62  ;;  %v3159_v47 = vpop.f32.mrb[60].mxu1 }
 0x92f   : > { %v2273_v30 = vadd.f32 %v3159_v47, %v4086_v40  ;;  %v2267_v2 = vpop.f32.mrb[61].mxu1  ;;  %v2335_v20 = vsel %vm864_vm2, %v2297_v51, 0.0 }
 0x930   : > { %v2268_v9 = vadd.f32 %v4086_v40, %v2267_v2  ;;  %2330 = vadd.xlane.f32.xlu0 %v2329_v48  ;;  %v2332_v10 = vsel %vm864_vm2, %v2296_v45, 0.0 }
 0x931   : > { %2333 = vadd.xlane.f32.xlu1 %v2332_v10  ;;  %v2299_v57 = vmul.f32 %v2273_v30, %v3933_v26  ;;  %v2412_v26 = vmul.f32 %v2379_v39, %v3771_v15 }
 0x932   : > { %v2298_v0 = vmul.f32 %v2268_v9, %v3936_v37  ;;  %v3162_v1 = vpop.f32.mrb[62].mxu1 }
 0x933   : > { %v2283_v62 = vadd.f32 %v3162_v1, %v4086_v40  ;;  %v2277_v7 = vpop.f32.mrb[63].mxu1  ;;  %v2341_v37 = vsel %vm864_vm2, %v2299_v57, 0.0  ;;  %v2456_v43 = vsel %vm864_vm2, %v2412_v26, 0.0 }
 0x934   : > { %v2278_v38 = vadd.f32 %v4086_v40, %v2277_v7  ;;  %2336 = vadd.xlane.f32.xlu0 %v2335_v20  ;;  %v2338_v6 = vsel %vm864_vm2, %v2298_v0, 0.0  ;;  %v2413_v40 = vmul.f32 %v2381_v16, %v3767_v12  ;;  %v2443_v12 = vpop.xlane.xlu0 %2442 }
 0x935   : > { %2339 = vadd.xlane.f32.xlu1 %v2338_v6  ;;  %v2301_v59 = vmul.f32 %v2283_v62, %v3943_v60 }
 0x936   : > { %v2300_v8 = vmul.f32 %v2278_v38, %v3946_v35  ;;  %v2459_v60 = vsel %vm864_vm2, %v2413_v40, 0.0  ;;  %v2416_v35 = vpop.xlane.xlu1 %2415 }
 0x937   : > { %v2347_v21 = vsel %vm864_vm2, %v2301_v59, 0.0 }
 0x938   : > { %2342 = vadd.xlane.f32.xlu0 %v2341_v37  ;;  %v2344_v18 = vsel %vm864_vm2, %v2300_v8, 0.0  ;;  %v2449_v49 = vpop.xlane.xlu0 %2448 }
 0x939   : > { %2345 = vadd.xlane.f32.xlu1 %v2344_v18 }
 0x93a   : > { %v2422_v15 = vpop.xlane.xlu1 %2421 }
 0x93c   : > { %2348 = vadd.xlane.f32.xlu0 %v2347_v21  ;;  %v2455_v56 = vpop.xlane.xlu0 %2454 }
 0x93d   : > { %2457 = vadd.xlane.f32.xlu1 %v2456_v43 }
 0x93e   : > { %v2428_v24 = vpop.xlane.xlu1 %2427 }
 0x940   : > { %2460 = vadd.xlane.f32.xlu0 %v2459_v60 }
 0x942   : > { %v2434_v25 = vpop.xlane.xlu1 %2433 }
 0x946   : > { %v2440_v63 = vpop.xlane.xlu1 %2439 }
 0x94a   : > { %v2446_v5 = vpop.xlane.xlu1 %2445 }
 0x94e   : > { %v2452_v44 = vpop.xlane.xlu1 %2451 }
 0x9a6   : > { %v2307_v29 = vpop.xlane.xlu1 %2306 }
 0x9a7   : > { %v2463_v31 = vadd.f32 %v2419_v41, %v2307_v29  ;;  %v2304_v32 = vpop.xlane.xlu0 %2303 }
 0x9a8   : > { %v2462_v55 = vadd.f32 %v2416_v35, %v2304_v32 }
 0x9a9   : > { %2480 = vst.msk [vmem:[%s4145_s21 + $0x8] sm:$0xff] %vm2478_vm4, %v2463_v31 }
 0x9aa   : > { %2479 = vst.msk [vmem:[%s4145_s21] sm:$0xff] %vm2478_vm4, %v2462_v55 }
 0x9ad   : > { %v2313_v11 = vpop.xlane.xlu0 %2312 }
 0x9ae   : > { %v2465_v13 = vadd.f32 %v2425_v23, %v2313_v11 }
 0x9b0   : > { %2482 = vst.msk [vmem:[%s4145_s21 + $0x18] sm:$0xff] %vm2478_vm4, %v2465_v13 }
 0x9b1   : > { %v2310_v46 = vpop.xlane.xlu0 %2309 }
 0x9b2   : > { %v2464_v28 = vadd.f32 %v2422_v15, %v2310_v46  ;;  %v2316_v52 = vpop.xlane.xlu1 %2315 }
 0x9b3   : > { %v2466_v33 = vadd.f32 %v2428_v24, %v2316_v52 }
 0x9b4   : > { %2481 = vst.msk [vmem:[%s4145_s21 + $0x10] sm:$0xff] %vm2478_vm4, %v2464_v28 }
 0x9b5   : > { %2483 = vst.msk [vmem:[%s4145_s21 + $0x20] sm:$0xff] %vm2478_vm4, %v2466_v33  ;;  %v2319_v19 = vpop.xlane.xlu0 %2318 }
 0x9b6   : > { %v2467_v34 = vadd.f32 %v2431_v14, %v2319_v19  ;;  %v2322_v17 = vpop.xlane.xlu1 %2321 }
 0x9b7   : > { %v2468_v61 = vadd.f32 %v2434_v25, %v2322_v17 }
 0x9b8   : > { %2484 = vst.msk [vmem:[%s4145_s21 + $0x28] sm:$0xff] %vm2478_vm4, %v2467_v34 }
 0x9b9   : > { %2485 = vst.msk [vmem:[%s4145_s21 + $0x30] sm:$0xff] %vm2478_vm4, %v2468_v61  ;;  %v2325_v53 = vpop.xlane.xlu0 %2324 }
 0x9ba   : > { %v2469_v36 = vadd.f32 %v2437_v27, %v2325_v53  ;;  %v2328_v54 = vpop.xlane.xlu1 %2327 }
 0x9bb   : > { %v2470_v4 = vadd.f32 %v2440_v63, %v2328_v54 }
 0x9bc   : > { %2486 = vst.msk [vmem:[%s4145_s21 + $0x38] sm:$0xff] %vm2478_vm4, %v2469_v36 }
 0x9bd   : > { %2487 = vst.msk [vmem:[%s4145_s21 + $0x40] sm:$0xff] %vm2478_vm4, %v2470_v4  ;;  %v2331_v22 = vpop.xlane.xlu0 %2330 }
 0x9be   : > { %v2471_v42 = vadd.f32 %v2443_v12, %v2331_v22  ;;  %v2334_v50 = vpop.xlane.xlu1 %2333 }
 0x9bf   : > { %v2472_v3 = vadd.f32 %v2446_v5, %v2334_v50 }
 0x9c0   : > { %2488 = vst.msk [vmem:[%s4145_s21 + $0x48] sm:$0xff] %vm2478_vm4, %v2471_v42 }
 0x9c1   : > { %2489 = vst.msk [vmem:[%s4145_s21 + $0x50] sm:$0xff] %vm2478_vm4, %v2472_v3  ;;  %v2337_v58 = vpop.xlane.xlu0 %2336 }
 0x9c2   : > { %v2473_v45 = vadd.f32 %v2449_v49, %v2337_v58  ;;  %v2340_v47 = vpop.xlane.xlu1 %2339 }
 0x9c3   : > { %v2474_v51 = vadd.f32 %v2452_v44, %v2340_v47 }
 0x9c4   : > { %2490 = vst.msk [vmem:[%s4145_s21 + $0x58] sm:$0xff] %vm2478_vm4, %v2473_v45 }
 0x9c5   : > { %2491 = vst.msk [vmem:[%s4145_s21 + $0x60] sm:$0xff] %vm2478_vm4, %v2474_v51  ;;  %v2343_v30 = vpop.xlane.xlu0 %2342 }
 0x9c6   : > { %v2475_v2 = vadd.f32 %v2455_v56, %v2343_v30  ;;  %v2346_v48 = vpop.xlane.xlu1 %2345 }
 0x9c8   : > { %2492 = vst.msk [vmem:[%s4145_s21 + $0x68] sm:$0xff] %vm2478_vm4, %v2475_v2 }
 0x9c9   : > { %v2349_v9 = vpop.xlane.xlu0 %2348 }
 0x9ca   : > { %v2458_v10 = vpop.xlane.xlu1 %2457 }
 0x9cb   : > { %v2476_v0 = vadd.f32 %v2458_v10, %v2346_v48 }
 0x9cd   : > { %2493 = vst.msk [vmem:[%s4145_s21 + $0x70] sm:$0xff] %vm2478_vm4, %v2476_v0  ;;  %v2461_v1 = vpop.xlane.xlu0 %2460 }
 0x9ce   : > { %v2477_v57 = vadd.f32 %v2461_v1, %v2349_v9 }
 0x9d0   : > { %2494 = vst.msk [vmem:[%s4145_s21 + $0x78] sm:$0xff] %vm2478_vm4, %v2477_v57 }
 0x9d1 PF: > { %p13_p6 = scmp.ge.s32.totalorder %s3513_s20, 4   ;;  %s4207_s9 = smov %s3433_s10 }
 0x9d2   : > { %s4208_s10 = smov %s3437_s11  ;;  %s4209_s11 = smov %s3542_s7 }
 0x9d3   : > { %s4210_s12 = smov %s3513_s20  ;;  %15 = sbr.rel (!%p13_p6) target bundleno = 4 (0x4), region = 72 }
 0x9da   :  { %2517 = vsyncpa [#allocation3], 1 }
 0x9db   :  { %2519 = vsyncpa [#allocation3 + $0x1], 1 }
 0x9dc   :  { %2520 = vsyncpa [#allocation5], 1 }

</bundles_post_ra>
